<compile_context>
chip_gen: v6e
topology: v6e:2x2x1
jax: 0.10.0
libtpu: 0.0.40
codegen_flags: <defaults>
</compile_context>

<pallas_src>
import functools
import math

import jax
import jax.numpy as jnp
from jax.experimental import pallas as pl
from jax.experimental.pallas import tpu as pltpu

LN_EPS = 1e-5


def _layernorm(x, gamma, beta):
    mean = jnp.mean(x, axis=-1, keepdims=True)
    var = jnp.mean((x - mean) ** 2, axis=-1, keepdims=True)
    return (x - mean) * jax.lax.rsqrt(var + LN_EPS) * gamma + beta


def _gelu_exact(x):
    # F.gelu default: exact erf formulation
    return x * 0.5 * (1.0 + jax.lax.erf(x * (1.0 / math.sqrt(2.0))))


def encoder_layer_kernel(
    x_ref,
    wq_ref, bq_ref, wk_ref, bk_ref, wv_ref, bv_ref,
    biask_ref, biasv_ref,
    wo_ref, bo_ref,
    ln1g_ref, ln1b_ref, ln2g_ref, ln2b_ref,
    w1_ref, b1_ref, w2_ref, b2_ref,
    y_ref, attnw_ref,
    *, num_heads, head_dim,
):
    Bb, T, E = x_ref.shape          # batch-block, time, embed
    N = Bb * T

    x = x_ref[...].astype(jnp.float32)          # (Bb, T, E)
    x2 = x.reshape(N, E)                        # row-wise view for LN / matmuls
    residual = x2

    # --- self_attn_layer_norm (f32 elementwise) ---
    xn = _layernorm(x2, ln1g_ref[...], ln1b_ref[...])
    xn_bf = xn.astype(jnp.bfloat16)

    # --- q/k/v projections: bf16 MXU matmuls, f32 accumulation ---
    scaling = head_dim ** (-0.5)
    q = (jnp.dot(xn_bf, wq_ref[...], preferred_element_type=jnp.float32)
         + bq_ref[...]) * scaling
    k = jnp.dot(xn_bf, wk_ref[...], preferred_element_type=jnp.float32) + bk_ref[...]
    v = jnp.dot(xn_bf, wv_ref[...], preferred_element_type=jnp.float32) + bv_ref[...]

    q_bf = q.astype(jnp.bfloat16).reshape(Bb, T, E)
    k_bf = k.astype(jnp.bfloat16).reshape(Bb, T, E)
    v_bf = v.astype(jnp.bfloat16).reshape(Bb, T, E)

    bias_k = biask_ref[...]     # (1, E) f32, appended as an extra (unprojected) key
    bias_v = biasv_ref[...]     # (1, E) f32

    acc = jnp.zeros((N, E), dtype=jnp.float32)            # out-proj accumulator
    wsum_main = jnp.zeros((Bb, T, T), dtype=jnp.float32)  # head-summed probs (real keys)
    wsum_bias = jnp.zeros((Bb, T, 1), dtype=jnp.float32)  # head-summed probs (bias key)

    # Static unroll over heads (H is small); contraction depth is head_dim only.
    for h in range(num_heads):
        lo = h * head_dim
        hi = lo + head_dim
        qh = q_bf[:, :, lo:hi]                 # (Bb, T, hd) bf16
        kh = k_bf[:, :, lo:hi]
        vh = v_bf[:, :, lo:hi]
        bkh = bias_k[:, lo:hi].reshape(1, 1, head_dim)   # f32
        bvh = bias_v[:, lo:hi].reshape(1, 1, head_dim)

        # scores over the T real keys, no transpose materialized: (Bb, T, T)
        s_main = jnp.einsum('bqd,bkd->bqk', qh, kh,
                            preferred_element_type=jnp.float32)
        # score against the appended bias_k key: (Bb, T, 1)
        s_bias = jnp.sum(qh.astype(jnp.float32) * bkh, axis=-1, keepdims=True)

        # softmax over src_len = T + 1, in float32
        m = jnp.maximum(jnp.max(s_main, axis=-1, keepdims=True), s_bias)
        p_main = jnp.exp(s_main - m)
        p_bias = jnp.exp(s_bias - m)
        inv = pl.reciprocal(jnp.sum(p_main, axis=-1, keepdims=True) + p_bias,
                            approx=True)
        p_main = p_main * inv
        p_bias = p_bias * inv

        wsum_main = wsum_main + p_main
        wsum_bias = wsum_bias + p_bias

        # per-head context: (Bb, T, hd)
        ctx = jnp.einsum('bqk,bkd->bqd', p_main.astype(jnp.bfloat16), vh,
                         preferred_element_type=jnp.float32)
        ctx = ctx + p_bias * bvh

        # out-proj contribution of this head: ctx_h @ Wo[lo:hi, :]
        acc = acc + jnp.dot(ctx.reshape(N, head_dim).astype(jnp.bfloat16),
                            wo_ref[lo:hi, :],
                            preferred_element_type=jnp.float32)

    attn_out = acc + bo_ref[...]

    # --- residual + FFN block ---
    x1 = residual + attn_out
    xn2 = _layernorm(x1, ln2g_ref[...], ln2b_ref[...])
    h1 = _gelu_exact(
        jnp.dot(xn2.astype(jnp.bfloat16), w1_ref[...],
                preferred_element_type=jnp.float32) + b1_ref[...])
    ffn = jnp.dot(h1.astype(jnp.bfloat16), w2_ref[...],
                  preferred_element_type=jnp.float32) + b2_ref[...]
    y = x1 + ffn

    y_ref[...] = y.reshape(Bb, T, E).astype(y_ref.dtype)

    # attention weights averaged over heads; src_len = T + 1 (bias_k column last).
    # Output block is lane-padded to a multiple of 128: the main (T-wide) store is
    # dense at production T; columns > T are padding sliced off in the wrapper.
    inv_h = 1.0 / num_heads
    attnw_ref[:, :, :T] = (wsum_main * inv_h).astype(attnw_ref.dtype)
    attnw_ref[:, :, T:T + 1] = (wsum_bias * inv_h).astype(attnw_ref.dtype)


def transformer_encoder_layer(x_tbe, params, *, num_heads, block_b=None):
    """x_tbe: (T, B, E) float32. Returns (y (T, B, E), attn (B, T, T+1))."""
    T, B, E = x_tbe.shape
    head_dim = E // num_heads
    assert head_dim * num_heads == E
    S = T + 1
    s_pad = ((S + 127) // 128) * 128            # lane-dense attn-weight buffer
    ffn_dim = params["w1"].shape[1]

    if block_b is None:
        # largest divisor of B whose per-step activation footprint stays modest
        per_batch = 4 * T * (8 * E + 3 * T + s_pad + 2 * ffn_dim)   # rough f32 bytes
        budget = 6 * 1024 * 1024
        block_b = 1
        for d in range(1, B + 1):
            if B % d == 0 and d * per_batch <= budget:
                block_b = d
    assert B % block_b == 0
    num_blocks = B // block_b

    x_bte = jnp.transpose(x_tbe, (1, 0, 2))     # kernel layout (B, T, E)

    def w(name):                                # MXU operands in bf16
        return params[name].astype(jnp.bfloat16)

    param_list = [
        w("wq"), params["bq"], w("wk"), params["bk"],
        w("wv"), params["bv"], params["bias_k"], params["bias_v"],
        w("wo"), params["bo"],
        params["ln1_g"], params["ln1_b"], params["ln2_g"], params["ln2_b"],
        w("w1"), params["b1"], w("w2"), params["b2"],
    ]
    # TODO(synk): for production E/FFN sizes, stream w1/w2 (and q/k/v/o weights)
    # through a grid axis or a single-buffered manual DMA so resident weights do
    # not exceed v7x's 64 MiB VMEM; full-resident bf16 blocks are fine here.

    def full_spec(shape):
        return pl.BlockSpec(shape, lambda b, _n=len(shape): (0,) * _n)

    in_specs = [pl.BlockSpec((block_b, T, E), lambda b: (b, 0, 0))]
    in_specs += [full_spec(p.shape) for p in param_list]

    out_specs = (
        pl.BlockSpec((block_b, T, E), lambda b: (b, 0, 0)),
        pl.BlockSpec((block_b, T, s_pad), lambda b: (b, 0, 0)),
    )
    out_shape = (
        jax.ShapeDtypeStruct((B, T, E), x_tbe.dtype),
        jax.ShapeDtypeStruct((B, T, s_pad), jnp.float32),
    )

    kernel = functools.partial(encoder_layer_kernel,
                               num_heads=num_heads, head_dim=head_dim)

    y_bte, attn_pad = pl.pallas_call(
        kernel,
        grid=(num_blocks,),
        in_specs=in_specs,
        out_specs=out_specs,
        out_shape=out_shape,
        compiler_params=pltpu.CompilerParams(
            dimension_semantics=("parallel",),      # batch blocks are independent
            vmem_limit_bytes=64 * 1024 * 1024,
        ),
    )(x_bte, *param_list)

    return jnp.transpose(y_bte, (1, 0, 2)), attn_pad[:, :, :S]


def _xavier_uniform(key, shape, gain=1.0):
    fan_in, fan_out = shape
    limit = gain * math.sqrt(6.0 / (fan_in + fan_out))
    return jax.random.uniform(key, shape, jnp.float32, -limit, limit)


def init_params(key, embed_dim, ffn_embed_dim):
    keys = jax.random.split(key, 12)
    g = 1.0 / math.sqrt(2.0)
    p = {
        # attention projections, stored as (in, out) so y = x @ W + b
        "wq": _xavier_uniform(keys[0], (embed_dim, embed_dim), gain=g),
        "bq": jnp.zeros((1, embed_dim), jnp.float32),
        "wk": _xavier_uniform(keys[1], (embed_dim, embed_dim), gain=g),
        "bk": jnp.zeros((1, embed_dim), jnp.float32),
        "wv": _xavier_uniform(keys[2], (embed_dim, embed_dim), gain=g),
        "bv": jnp.zeros((1, embed_dim), jnp.float32),
        "bias_k": 0.02 * jax.random.normal(keys[3], (1, embed_dim), jnp.float32),
        "bias_v": 0.02 * jax.random.normal(keys[4], (1, embed_dim), jnp.float32),
        "wo": _xavier_uniform(keys[5], (embed_dim, embed_dim)),
        "bo": jnp.zeros((1, embed_dim), jnp.float32),
        # layer norms
        "ln1_g": jnp.ones((1, embed_dim), jnp.float32),
        "ln1_b": jnp.zeros((1, embed_dim), jnp.float32),
        "ln2_g": jnp.ones((1, embed_dim), jnp.float32),
        "ln2_b": jnp.zeros((1, embed_dim), jnp.float32),
        # FFN
        "w1": _xavier_uniform(keys[6], (embed_dim, ffn_embed_dim)),
        "b1": jnp.zeros((1, ffn_embed_dim), jnp.float32),
        "w2": _xavier_uniform(keys[7], (ffn_embed_dim, embed_dim)),
        "b2": jnp.zeros((1, embed_dim), jnp.float32),
    }
    return p


if __name__ == "__main__":
    # small shapes consistent with the module's (T, B, E) forward
    T, B, E, H, FFN = 8, 2, 32, 4, 64

    key = jax.random.PRNGKey(0)
    k_x, k_p = jax.random.split(key)
    x = jax.random.normal(k_x, (T, B, E), jnp.float32)
    params = init_params(k_p, E, FFN)

    # TODO(synk): dropout (p=0.0 here), attn_mask / key_padding_mask and
    # incremental_state paths are omitted (no-op / inference-only semantics).
    y, attn = jax.jit(
        functools.partial(transformer_encoder_layer, num_heads=H)
    )(x, params)
    jax.block_until_ready((y, attn))

    assert y.shape == (T, B, E)
    assert attn.shape == (B, T, T + 1)
    print("KERNEL_OK")
</pallas_src>

<mosaic_0001>
module attributes {stable_mosaic.version = 11 : i64} {
  func.func @encoder_layer_kernel(%arg0: i32, %arg1: memref<2x8x32xf32, #tpu.memory_space<vmem>>, %arg2: memref<32x32xbf16, #tpu.memory_space<vmem>>, %arg3: memref<1x32xf32, #tpu.memory_space<vmem>>, %arg4: memref<32x32xbf16, #tpu.memory_space<vmem>>, %arg5: memref<1x32xf32, #tpu.memory_space<vmem>>, %arg6: memref<32x32xbf16, #tpu.memory_space<vmem>>, %arg7: memref<1x32xf32, #tpu.memory_space<vmem>>, %arg8: memref<1x32xf32, #tpu.memory_space<vmem>>, %arg9: memref<1x32xf32, #tpu.memory_space<vmem>>, %arg10: memref<32x32xbf16, #tpu.memory_space<vmem>>, %arg11: memref<1x32xf32, #tpu.memory_space<vmem>>, %arg12: memref<1x32xf32, #tpu.memory_space<vmem>>, %arg13: memref<1x32xf32, #tpu.memory_space<vmem>>, %arg14: memref<1x32xf32, #tpu.memory_space<vmem>>, %arg15: memref<1x32xf32, #tpu.memory_space<vmem>>, %arg16: memref<32x64xbf16, #tpu.memory_space<vmem>>, %arg17: memref<1x64xf32, #tpu.memory_space<vmem>>, %arg18: memref<64x32xbf16, #tpu.memory_space<vmem>>, %arg19: memref<1x32xf32, #tpu.memory_space<vmem>>, %arg20: memref<2x8x32xf32, #tpu.memory_space<vmem>>, %arg21: memref<2x8x128xf32, #tpu.memory_space<vmem>>) attributes {dimension_semantics = [#tpu.dimension_semantics<parallel>], iteration_bounds = array<i64: 1>, scalar_prefetch = 0 : i64, scratch_operands = 0 : i64, tpu.core_type = #tpu.core_type<tc>, window_params = [{transform_indices = @transform_0, window_bounds = array<i64: 2, 8, 32>}, {pipeline_mode = #tpu.pipeline_mode<synchronous>, transform_indices = @transform_1, window_bounds = array<i64: 32, 32>}, {pipeline_mode = #tpu.pipeline_mode<synchronous>, transform_indices = @transform_2, window_bounds = array<i64: 1, 32>}, {pipeline_mode = #tpu.pipeline_mode<synchronous>, transform_indices = @transform_3, window_bounds = array<i64: 32, 32>}, {pipeline_mode = #tpu.pipeline_mode<synchronous>, transform_indices = @transform_4, window_bounds = array<i64: 1, 32>}, {pipeline_mode = #tpu.pipeline_mode<synchronous>, transform_indices = @transform_5, window_bounds = array<i64: 32, 32>}, {pipeline_mode = #tpu.pipeline_mode<synchronous>, transform_indices = @transform_6, window_bounds = array<i64: 1, 32>}, {pipeline_mode = #tpu.pipeline_mode<synchronous>, transform_indices = @transform_7, window_bounds = array<i64: 1, 32>}, {pipeline_mode = #tpu.pipeline_mode<synchronous>, transform_indices = @transform_8, window_bounds = array<i64: 1, 32>}, {pipeline_mode = #tpu.pipeline_mode<synchronous>, transform_indices = @transform_9, window_bounds = array<i64: 32, 32>}, {pipeline_mode = #tpu.pipeline_mode<synchronous>, transform_indices = @transform_10, window_bounds = array<i64: 1, 32>}, {pipeline_mode = #tpu.pipeline_mode<synchronous>, transform_indices = @transform_11, window_bounds = array<i64: 1, 32>}, {pipeline_mode = #tpu.pipeline_mode<synchronous>, transform_indices = @transform_12, window_bounds = array<i64: 1, 32>}, {pipeline_mode = #tpu.pipeline_mode<synchronous>, transform_indices = @transform_13, window_bounds = array<i64: 1, 32>}, {pipeline_mode = #tpu.pipeline_mode<synchronous>, transform_indices = @transform_14, window_bounds = array<i64: 1, 32>}, {pipeline_mode = #tpu.pipeline_mode<synchronous>, transform_indices = @transform_15, window_bounds = array<i64: 32, 64>}, {pipeline_mode = #tpu.pipeline_mode<synchronous>, transform_indices = @transform_16, window_bounds = array<i64: 1, 64>}, {pipeline_mode = #tpu.pipeline_mode<synchronous>, transform_indices = @transform_17, window_bounds = array<i64: 64, 32>}, {pipeline_mode = #tpu.pipeline_mode<synchronous>, transform_indices = @transform_18, window_bounds = array<i64: 1, 32>}, {transform_indices = @transform_19, window_bounds = array<i64: 2, 8, 32>}, {transform_indices = @transform_20, window_bounds = array<i64: 2, 8, 128>}]} {
    %c0 = arith.constant 0 : index
    %c0_0 = arith.constant 0 : index
    %c0_1 = arith.constant 0 : index
    %0 = vector.load %arg1[%c0, %c0_0, %c0_1] : memref<2x8x32xf32, #tpu.memory_space<vmem>>, vector<2x8x32xf32>
    %1 = vector.shape_cast %0 : vector<2x8x32xf32> to vector<16x32xf32>
    %c0_2 = arith.constant 0 : index
    %c0_3 = arith.constant 0 : index
    %2 = vector.load %arg12[%c0_2, %c0_3] : memref<1x32xf32, #tpu.memory_space<vmem>>, vector<1x32xf32>
    %c0_4 = arith.constant 0 : index
    %c0_5 = arith.constant 0 : index
    %3 = vector.load %arg13[%c0_4, %c0_5] : memref<1x32xf32, #tpu.memory_space<vmem>>, vector<1x32xf32>
    %cst = arith.constant dense<0.000000e+00> : vector<16xf32>
    %4 = vector.multi_reduction <add>, %1, %cst [1] : vector<16x32xf32> to vector<16xf32>
    %5 = vector.shape_cast %4 : vector<16xf32> to vector<16x1xf32>
    %cst_6 = arith.constant 3.200000e+01 : f32
    %6 = vector.broadcast %cst_6 : f32 to vector<16x1xf32>
    %7 = arith.divf %5, %6 : vector<16x1xf32>
    %8 = vector.broadcast %7 : vector<16x1xf32> to vector<16x32xf32>
    %9 = arith.subf %1, %8 : vector<16x32xf32>
    %10 = arith.mulf %9, %9 : vector<16x32xf32>
    %cst_7 = arith.constant dense<0.000000e+00> : vector<16xf32>
    %11 = vector.multi_reduction <add>, %10, %cst_7 [1] : vector<16x32xf32> to vector<16xf32>
    %12 = vector.shape_cast %11 : vector<16xf32> to vector<16x1xf32>
    %cst_8 = arith.constant 3.200000e+01 : f32
    %13 = vector.broadcast %cst_8 : f32 to vector<16x1xf32>
    %14 = arith.divf %12, %13 : vector<16x1xf32>
    %15 = vector.broadcast %7 : vector<16x1xf32> to vector<16x32xf32>
    %16 = arith.subf %1, %15 : vector<16x32xf32>
    %cst_9 = arith.constant 9.99999974E-6 : f32
    %17 = vector.broadcast %cst_9 : f32 to vector<16x1xf32>
    %18 = arith.addf %14, %17 : vector<16x1xf32>
    %19 = math.rsqrt %18 : vector<16x1xf32>
    %20 = vector.broadcast %19 : vector<16x1xf32> to vector<16x32xf32>
    %21 = arith.mulf %16, %20 : vector<16x32xf32>
    %22 = vector.broadcast %2 : vector<1x32xf32> to vector<16x32xf32>
    %23 = arith.mulf %21, %22 : vector<16x32xf32>
    %24 = vector.broadcast %3 : vector<1x32xf32> to vector<16x32xf32>
    %25 = arith.addf %23, %24 : vector<16x32xf32>
    %26 = arith.truncf %25 : vector<16x32xf32> to vector<16x32xbf16>
    %c0_10 = arith.constant 0 : index
    %c0_11 = arith.constant 0 : index
    %27 = vector.load %arg2[%c0_10, %c0_11] : memref<32x32xbf16, #tpu.memory_space<vmem>>, vector<32x32xbf16>
    %cst_12 = arith.constant dense<0.000000e+00> : vector<16x32xf32>
    %28 = tpu.matmul %26, %27, %cst_12 {dimension_numbers = #tpu.dot_dimension_numbers<[1], [0], [0], [1], [0, 0, 1, 1], [], []>} : vector<16x32xbf16>, vector<32x32xbf16>, vector<16x32xf32> -> vector<16x32xf32>
    %c0_13 = arith.constant 0 : index
    %c0_14 = arith.constant 0 : index
    %29 = vector.load %arg3[%c0_13, %c0_14] : memref<1x32xf32, #tpu.memory_space<vmem>>, vector<1x32xf32>
    %30 = vector.broadcast %29 : vector<1x32xf32> to vector<16x32xf32>
    %31 = arith.addf %28, %30 : vector<16x32xf32>
    %cst_15 = arith.constant 0.353553385 : f32
    %32 = vector.broadcast %cst_15 : f32 to vector<16x32xf32>
    %33 = arith.mulf %31, %32 : vector<16x32xf32>
    %c0_16 = arith.constant 0 : index
    %c0_17 = arith.constant 0 : index
    %34 = vector.load %arg4[%c0_16, %c0_17] : memref<32x32xbf16, #tpu.memory_space<vmem>>, vector<32x32xbf16>
    %cst_18 = arith.constant dense<0.000000e+00> : vector<16x32xf32>
    %35 = tpu.matmul %26, %34, %cst_18 {dimension_numbers = #tpu.dot_dimension_numbers<[1], [0], [0], [1], [0, 0, 1, 1], [], []>} : vector<16x32xbf16>, vector<32x32xbf16>, vector<16x32xf32> -> vector<16x32xf32>
    %c0_19 = arith.constant 0 : index
    %c0_20 = arith.constant 0 : index
    %36 = vector.load %arg5[%c0_19, %c0_20] : memref<1x32xf32, #tpu.memory_space<vmem>>, vector<1x32xf32>
    %37 = vector.broadcast %36 : vector<1x32xf32> to vector<16x32xf32>
    %38 = arith.addf %35, %37 : vector<16x32xf32>
    %c0_21 = arith.constant 0 : index
    %c0_22 = arith.constant 0 : index
    %39 = vector.load %arg6[%c0_21, %c0_22] : memref<32x32xbf16, #tpu.memory_space<vmem>>, vector<32x32xbf16>
    %cst_23 = arith.constant dense<0.000000e+00> : vector<16x32xf32>
    %40 = tpu.matmul %26, %39, %cst_23 {dimension_numbers = #tpu.dot_dimension_numbers<[1], [0], [0], [1], [0, 0, 1, 1], [], []>} : vector<16x32xbf16>, vector<32x32xbf16>, vector<16x32xf32> -> vector<16x32xf32>
    %c0_24 = arith.constant 0 : index
    %c0_25 = arith.constant 0 : index
    %41 = vector.load %arg7[%c0_24, %c0_25] : memref<1x32xf32, #tpu.memory_space<vmem>>, vector<1x32xf32>
    %42 = vector.broadcast %41 : vector<1x32xf32> to vector<16x32xf32>
    %43 = arith.addf %40, %42 : vector<16x32xf32>
    %44 = arith.truncf %33 : vector<16x32xf32> to vector<16x32xbf16>
    %45 = vector.shape_cast %44 : vector<16x32xbf16> to vector<2x8x32xbf16>
    %46 = arith.truncf %38 : vector<16x32xf32> to vector<16x32xbf16>
    %47 = vector.shape_cast %46 : vector<16x32xbf16> to vector<2x8x32xbf16>
    %48 = arith.truncf %43 : vector<16x32xf32> to vector<16x32xbf16>
    %49 = vector.shape_cast %48 : vector<16x32xbf16> to vector<2x8x32xbf16>
    %c0_26 = arith.constant 0 : index
    %c0_27 = arith.constant 0 : index
    %50 = vector.load %arg8[%c0_26, %c0_27] : memref<1x32xf32, #tpu.memory_space<vmem>>, vector<1x32xf32>
    %c0_28 = arith.constant 0 : index
    %c0_29 = arith.constant 0 : index
    %51 = vector.load %arg9[%c0_28, %c0_29] : memref<1x32xf32, #tpu.memory_space<vmem>>, vector<1x32xf32>
    %cst_30 = arith.constant 0.000000e+00 : f32
    %52 = vector.broadcast %cst_30 : f32 to vector<16x32xf32>
    %cst_31 = arith.constant 0.000000e+00 : f32
    %53 = vector.broadcast %cst_31 : f32 to vector<2x8x8xf32>
    %cst_32 = arith.constant 0.000000e+00 : f32
    %54 = vector.broadcast %cst_32 : f32 to vector<2x8x1xf32>
    %55 = vector.extract_strided_slice %45 {offsets = [0, 0, 0], sizes = [2, 8, 8], strides = [1, 1, 1]} : vector<2x8x32xbf16> to vector<2x8x8xbf16>
    %56 = vector.extract_strided_slice %47 {offsets = [0, 0, 0], sizes = [2, 8, 8], strides = [1, 1, 1]} : vector<2x8x32xbf16> to vector<2x8x8xbf16>
    %57 = vector.extract_strided_slice %49 {offsets = [0, 0, 0], sizes = [2, 8, 8], strides = [1, 1, 1]} : vector<2x8x32xbf16> to vector<2x8x8xbf16>
    %58 = vector.extract_strided_slice %50 {offsets = [0, 0], sizes = [1, 8], strides = [1, 1]} : vector<1x32xf32> to vector<1x8xf32>
    %59 = vector.shape_cast %58 : vector<1x8xf32> to vector<1x1x8xf32>
    %60 = vector.extract_strided_slice %51 {offsets = [0, 0], sizes = [1, 8], strides = [1, 1]} : vector<1x32xf32> to vector<1x8xf32>
    %61 = vector.shape_cast %60 : vector<1x8xf32> to vector<1x1x8xf32>
    "tpu.trace_start"() <{level = 10 : i32, message = "bqd,bkd->bqk"}> : () -> ()
    %cst_33 = arith.constant dense<0.000000e+00> : vector<2x8x8xf32>
    %62 = tpu.matmul %55, %56, %cst_33 {dimension_numbers = #tpu.dot_dimension_numbers<[2], [2], [1], [1], [0, 0, 0, 1, 1, 1], [0], [0]>} : vector<2x8x8xbf16>, vector<2x8x8xbf16>, vector<2x8x8xf32> -> vector<2x8x8xf32>
    "tpu.trace_stop"() : () -> ()
    %63 = arith.extf %55 : vector<2x8x8xbf16> to vector<2x8x8xf32>
    %64 = vector.broadcast %59 : vector<1x1x8xf32> to vector<2x8x8xf32>
    %65 = arith.mulf %63, %64 : vector<2x8x8xf32>
    %cst_34 = arith.constant dense<0.000000e+00> : vector<2x8xf32>
    %66 = vector.multi_reduction <add>, %65, %cst_34 [2] : vector<2x8x8xf32> to vector<2x8xf32>
    %67 = vector.shape_cast %66 : vector<2x8xf32> to vector<2x8x1xf32>
    %cst_35 = arith.constant dense<0xFF800000> : vector<2x8xf32>
    %68 = vector.multi_reduction <maximumf>, %62, %cst_35 [2] : vector<2x8x8xf32> to vector<2x8xf32>
    %69 = vector.shape_cast %68 : vector<2x8xf32> to vector<2x8x1xf32>
    %70 = arith.maximumf %69, %67 : vector<2x8x1xf32>
    %71 = vector.broadcast %70 : vector<2x8x1xf32> to vector<2x8x8xf32>
    %72 = arith.subf %62, %71 : vector<2x8x8xf32>
    %73 = math.exp %72 : vector<2x8x8xf32>
    %74 = arith.subf %67, %70 : vector<2x8x1xf32>
    %75 = math.exp %74 : vector<2x8x1xf32>
    %cst_36 = arith.constant dense<0.000000e+00> : vector<2x8xf32>
    %76 = vector.multi_reduction <add>, %73, %cst_36 [2] : vector<2x8x8xf32> to vector<2x8xf32>
    %77 = vector.shape_cast %76 : vector<2x8xf32> to vector<2x8x1xf32>
    %78 = arith.addf %77, %75 : vector<2x8x1xf32>
    %79 = tpu.reciprocal %78 {approx = true} : vector<2x8x1xf32> -> vector<2x8x1xf32>
    %80 = vector.broadcast %79 : vector<2x8x1xf32> to vector<2x8x8xf32>
    %81 = arith.mulf %73, %80 : vector<2x8x8xf32>
    %82 = arith.mulf %75, %79 : vector<2x8x1xf32>
    %83 = arith.addf %53, %81 : vector<2x8x8xf32>
    %84 = arith.addf %54, %82 : vector<2x8x1xf32>
    %85 = arith.truncf %81 : vector<2x8x8xf32> to vector<2x8x8xbf16>
    "tpu.trace_start"() <{level = 10 : i32, message = "bqk,bkd->bqd"}> : () -> ()
    %cst_37 = arith.constant dense<0.000000e+00> : vector<2x8x8xf32>
    %86 = tpu.matmul %85, %57, %cst_37 {dimension_numbers = #tpu.dot_dimension_numbers<[2], [1], [1], [2], [0, 0, 0, 1, 1, 2], [0], [0]>} : vector<2x8x8xbf16>, vector<2x8x8xbf16>, vector<2x8x8xf32> -> vector<2x8x8xf32>
    "tpu.trace_stop"() : () -> ()
    %87 = vector.broadcast %82 : vector<2x8x1xf32> to vector<2x8x8xf32>
    %88 = vector.broadcast %61 : vector<1x1x8xf32> to vector<2x8x8xf32>
    %89 = arith.mulf %87, %88 : vector<2x8x8xf32>
    %90 = arith.addf %86, %89 : vector<2x8x8xf32>
    %91 = vector.shape_cast %90 : vector<2x8x8xf32> to vector<16x8xf32>
    %92 = arith.truncf %91 : vector<16x8xf32> to vector<16x8xbf16>
    %c0_38 = arith.constant 0 : index
    %c0_39 = arith.constant 0 : index
    %93 = vector.load %arg10[%c0_38, %c0_39] : memref<32x32xbf16, #tpu.memory_space<vmem>>, vector<8x32xbf16>
    %cst_40 = arith.constant dense<0.000000e+00> : vector<16x32xf32>
    %94 = tpu.matmul %92, %93, %cst_40 {dimension_numbers = #tpu.dot_dimension_numbers<[1], [0], [0], [1], [0, 0, 1, 1], [], []>} : vector<16x8xbf16>, vector<8x32xbf16>, vector<16x32xf32> -> vector<16x32xf32>
    %95 = arith.addf %52, %94 : vector<16x32xf32>
    %96 = vector.extract_strided_slice %45 {offsets = [0, 0, 8], sizes = [2, 8, 8], strides = [1, 1, 1]} : vector<2x8x32xbf16> to vector<2x8x8xbf16>
    %97 = vector.extract_strided_slice %47 {offsets = [0, 0, 8], sizes = [2, 8, 8], strides = [1, 1, 1]} : vector<2x8x32xbf16> to vector<2x8x8xbf16>
    %98 = vector.extract_strided_slice %49 {offsets = [0, 0, 8], sizes = [2, 8, 8], strides = [1, 1, 1]} : vector<2x8x32xbf16> to vector<2x8x8xbf16>
    %99 = vector.extract_strided_slice %50 {offsets = [0, 8], sizes = [1, 8], strides = [1, 1]} : vector<1x32xf32> to vector<1x8xf32>
    %100 = vector.shape_cast %99 : vector<1x8xf32> to vector<1x1x8xf32>
    %101 = vector.extract_strided_slice %51 {offsets = [0, 8], sizes = [1, 8], strides = [1, 1]} : vector<1x32xf32> to vector<1x8xf32>
    %102 = vector.shape_cast %101 : vector<1x8xf32> to vector<1x1x8xf32>
    "tpu.trace_start"() <{level = 10 : i32, message = "bqd,bkd->bqk"}> : () -> ()
    %cst_41 = arith.constant dense<0.000000e+00> : vector<2x8x8xf32>
    %103 = tpu.matmul %96, %97, %cst_41 {dimension_numbers = #tpu.dot_dimension_numbers<[2], [2], [1], [1], [0, 0, 0, 1, 1, 1], [0], [0]>} : vector<2x8x8xbf16>, vector<2x8x8xbf16>, vector<2x8x8xf32> -> vector<2x8x8xf32>
    "tpu.trace_stop"() : () -> ()
    %104 = arith.extf %96 : vector<2x8x8xbf16> to vector<2x8x8xf32>
    %105 = vector.broadcast %100 : vector<1x1x8xf32> to vector<2x8x8xf32>
    %106 = arith.mulf %104, %105 : vector<2x8x8xf32>
    %cst_42 = arith.constant dense<0.000000e+00> : vector<2x8xf32>
    %107 = vector.multi_reduction <add>, %106, %cst_42 [2] : vector<2x8x8xf32> to vector<2x8xf32>
    %108 = vector.shape_cast %107 : vector<2x8xf32> to vector<2x8x1xf32>
    %cst_43 = arith.constant dense<0xFF800000> : vector<2x8xf32>
    %109 = vector.multi_reduction <maximumf>, %103, %cst_43 [2] : vector<2x8x8xf32> to vector<2x8xf32>
    %110 = vector.shape_cast %109 : vector<2x8xf32> to vector<2x8x1xf32>
    %111 = arith.maximumf %110, %108 : vector<2x8x1xf32>
    %112 = vector.broadcast %111 : vector<2x8x1xf32> to vector<2x8x8xf32>
    %113 = arith.subf %103, %112 : vector<2x8x8xf32>
    %114 = math.exp %113 : vector<2x8x8xf32>
    %115 = arith.subf %108, %111 : vector<2x8x1xf32>
    %116 = math.exp %115 : vector<2x8x1xf32>
    %cst_44 = arith.constant dense<0.000000e+00> : vector<2x8xf32>
    %117 = vector.multi_reduction <add>, %114, %cst_44 [2] : vector<2x8x8xf32> to vector<2x8xf32>
    %118 = vector.shape_cast %117 : vector<2x8xf32> to vector<2x8x1xf32>
    %119 = arith.addf %118, %116 : vector<2x8x1xf32>
    %120 = tpu.reciprocal %119 {approx = true} : vector<2x8x1xf32> -> vector<2x8x1xf32>
    %121 = vector.broadcast %120 : vector<2x8x1xf32> to vector<2x8x8xf32>
    %122 = arith.mulf %114, %121 : vector<2x8x8xf32>
    %123 = arith.mulf %116, %120 : vector<2x8x1xf32>
    %124 = arith.addf %83, %122 : vector<2x8x8xf32>
    %125 = arith.addf %84, %123 : vector<2x8x1xf32>
    %126 = arith.truncf %122 : vector<2x8x8xf32> to vector<2x8x8xbf16>
    "tpu.trace_start"() <{level = 10 : i32, message = "bqk,bkd->bqd"}> : () -> ()
    %cst_45 = arith.constant dense<0.000000e+00> : vector<2x8x8xf32>
    %127 = tpu.matmul %126, %98, %cst_45 {dimension_numbers = #tpu.dot_dimension_numbers<[2], [1], [1], [2], [0, 0, 0, 1, 1, 2], [0], [0]>} : vector<2x8x8xbf16>, vector<2x8x8xbf16>, vector<2x8x8xf32> -> vector<2x8x8xf32>
    "tpu.trace_stop"() : () -> ()
    %128 = vector.broadcast %123 : vector<2x8x1xf32> to vector<2x8x8xf32>
    %129 = vector.broadcast %102 : vector<1x1x8xf32> to vector<2x8x8xf32>
    %130 = arith.mulf %128, %129 : vector<2x8x8xf32>
    %131 = arith.addf %127, %130 : vector<2x8x8xf32>
    %132 = vector.shape_cast %131 : vector<2x8x8xf32> to vector<16x8xf32>
    %133 = arith.truncf %132 : vector<16x8xf32> to vector<16x8xbf16>
    %c8 = arith.constant 8 : index
    %c0_46 = arith.constant 0 : index
    %134 = vector.load %arg10[%c8, %c0_46] : memref<32x32xbf16, #tpu.memory_space<vmem>>, vector<8x32xbf16>
    %cst_47 = arith.constant dense<0.000000e+00> : vector<16x32xf32>
    %135 = tpu.matmul %133, %134, %cst_47 {dimension_numbers = #tpu.dot_dimension_numbers<[1], [0], [0], [1], [0, 0, 1, 1], [], []>} : vector<16x8xbf16>, vector<8x32xbf16>, vector<16x32xf32> -> vector<16x32xf32>
    %136 = arith.addf %95, %135 : vector<16x32xf32>
    %137 = vector.extract_strided_slice %45 {offsets = [0, 0, 16], sizes = [2, 8, 8], strides = [1, 1, 1]} : vector<2x8x32xbf16> to vector<2x8x8xbf16>
    %138 = vector.extract_strided_slice %47 {offsets = [0, 0, 16], sizes = [2, 8, 8], strides = [1, 1, 1]} : vector<2x8x32xbf16> to vector<2x8x8xbf16>
    %139 = vector.extract_strided_slice %49 {offsets = [0, 0, 16], sizes = [2, 8, 8], strides = [1, 1, 1]} : vector<2x8x32xbf16> to vector<2x8x8xbf16>
    %140 = vector.extract_strided_slice %50 {offsets = [0, 16], sizes = [1, 8], strides = [1, 1]} : vector<1x32xf32> to vector<1x8xf32>
    %141 = vector.shape_cast %140 : vector<1x8xf32> to vector<1x1x8xf32>
    %142 = vector.extract_strided_slice %51 {offsets = [0, 16], sizes = [1, 8], strides = [1, 1]} : vector<1x32xf32> to vector<1x8xf32>
    %143 = vector.shape_cast %142 : vector<1x8xf32> to vector<1x1x8xf32>
    "tpu.trace_start"() <{level = 10 : i32, message = "bqd,bkd->bqk"}> : () -> ()
    %cst_48 = arith.constant dense<0.000000e+00> : vector<2x8x8xf32>
    %144 = tpu.matmul %137, %138, %cst_48 {dimension_numbers = #tpu.dot_dimension_numbers<[2], [2], [1], [1], [0, 0, 0, 1, 1, 1], [0], [0]>} : vector<2x8x8xbf16>, vector<2x8x8xbf16>, vector<2x8x8xf32> -> vector<2x8x8xf32>
    "tpu.trace_stop"() : () -> ()
    %145 = arith.extf %137 : vector<2x8x8xbf16> to vector<2x8x8xf32>
    %146 = vector.broadcast %141 : vector<1x1x8xf32> to vector<2x8x8xf32>
    %147 = arith.mulf %145, %146 : vector<2x8x8xf32>
    %cst_49 = arith.constant dense<0.000000e+00> : vector<2x8xf32>
    %148 = vector.multi_reduction <add>, %147, %cst_49 [2] : vector<2x8x8xf32> to vector<2x8xf32>
    %149 = vector.shape_cast %148 : vector<2x8xf32> to vector<2x8x1xf32>
    %cst_50 = arith.constant dense<0xFF800000> : vector<2x8xf32>
    %150 = vector.multi_reduction <maximumf>, %144, %cst_50 [2] : vector<2x8x8xf32> to vector<2x8xf32>
    %151 = vector.shape_cast %150 : vector<2x8xf32> to vector<2x8x1xf32>
    %152 = arith.maximumf %151, %149 : vector<2x8x1xf32>
    %153 = vector.broadcast %152 : vector<2x8x1xf32> to vector<2x8x8xf32>
    %154 = arith.subf %144, %153 : vector<2x8x8xf32>
    %155 = math.exp %154 : vector<2x8x8xf32>
    %156 = arith.subf %149, %152 : vector<2x8x1xf32>
    %157 = math.exp %156 : vector<2x8x1xf32>
    %cst_51 = arith.constant dense<0.000000e+00> : vector<2x8xf32>
    %158 = vector.multi_reduction <add>, %155, %cst_51 [2] : vector<2x8x8xf32> to vector<2x8xf32>
    %159 = vector.shape_cast %158 : vector<2x8xf32> to vector<2x8x1xf32>
    %160 = arith.addf %159, %157 : vector<2x8x1xf32>
    %161 = tpu.reciprocal %160 {approx = true} : vector<2x8x1xf32> -> vector<2x8x1xf32>
    %162 = vector.broadcast %161 : vector<2x8x1xf32> to vector<2x8x8xf32>
    %163 = arith.mulf %155, %162 : vector<2x8x8xf32>
    %164 = arith.mulf %157, %161 : vector<2x8x1xf32>
    %165 = arith.addf %124, %163 : vector<2x8x8xf32>
    %166 = arith.addf %125, %164 : vector<2x8x1xf32>
    %167 = arith.truncf %163 : vector<2x8x8xf32> to vector<2x8x8xbf16>
    "tpu.trace_start"() <{level = 10 : i32, message = "bqk,bkd->bqd"}> : () -> ()
    %cst_52 = arith.constant dense<0.000000e+00> : vector<2x8x8xf32>
    %168 = tpu.matmul %167, %139, %cst_52 {dimension_numbers = #tpu.dot_dimension_numbers<[2], [1], [1], [2], [0, 0, 0, 1, 1, 2], [0], [0]>} : vector<2x8x8xbf16>, vector<2x8x8xbf16>, vector<2x8x8xf32> -> vector<2x8x8xf32>
    "tpu.trace_stop"() : () -> ()
    %169 = vector.broadcast %164 : vector<2x8x1xf32> to vector<2x8x8xf32>
    %170 = vector.broadcast %143 : vector<1x1x8xf32> to vector<2x8x8xf32>
    %171 = arith.mulf %169, %170 : vector<2x8x8xf32>
    %172 = arith.addf %168, %171 : vector<2x8x8xf32>
    %173 = vector.shape_cast %172 : vector<2x8x8xf32> to vector<16x8xf32>
    %174 = arith.truncf %173 : vector<16x8xf32> to vector<16x8xbf16>
    %c16 = arith.constant 16 : index
    %c0_53 = arith.constant 0 : index
    %175 = vector.load %arg10[%c16, %c0_53] : memref<32x32xbf16, #tpu.memory_space<vmem>>, vector<8x32xbf16>
    %cst_54 = arith.constant dense<0.000000e+00> : vector<16x32xf32>
    %176 = tpu.matmul %174, %175, %cst_54 {dimension_numbers = #tpu.dot_dimension_numbers<[1], [0], [0], [1], [0, 0, 1, 1], [], []>} : vector<16x8xbf16>, vector<8x32xbf16>, vector<16x32xf32> -> vector<16x32xf32>
    %177 = arith.addf %136, %176 : vector<16x32xf32>
    %178 = vector.extract_strided_slice %45 {offsets = [0, 0, 24], sizes = [2, 8, 8], strides = [1, 1, 1]} : vector<2x8x32xbf16> to vector<2x8x8xbf16>
    %179 = vector.extract_strided_slice %47 {offsets = [0, 0, 24], sizes = [2, 8, 8], strides = [1, 1, 1]} : vector<2x8x32xbf16> to vector<2x8x8xbf16>
    %180 = vector.extract_strided_slice %49 {offsets = [0, 0, 24], sizes = [2, 8, 8], strides = [1, 1, 1]} : vector<2x8x32xbf16> to vector<2x8x8xbf16>
    %181 = vector.extract_strided_slice %50 {offsets = [0, 24], sizes = [1, 8], strides = [1, 1]} : vector<1x32xf32> to vector<1x8xf32>
    %182 = vector.shape_cast %181 : vector<1x8xf32> to vector<1x1x8xf32>
    %183 = vector.extract_strided_slice %51 {offsets = [0, 24], sizes = [1, 8], strides = [1, 1]} : vector<1x32xf32> to vector<1x8xf32>
    %184 = vector.shape_cast %183 : vector<1x8xf32> to vector<1x1x8xf32>
    "tpu.trace_start"() <{level = 10 : i32, message = "bqd,bkd->bqk"}> : () -> ()
    %cst_55 = arith.constant dense<0.000000e+00> : vector<2x8x8xf32>
    %185 = tpu.matmul %178, %179, %cst_55 {dimension_numbers = #tpu.dot_dimension_numbers<[2], [2], [1], [1], [0, 0, 0, 1, 1, 1], [0], [0]>} : vector<2x8x8xbf16>, vector<2x8x8xbf16>, vector<2x8x8xf32> -> vector<2x8x8xf32>
    "tpu.trace_stop"() : () -> ()
    %186 = arith.extf %178 : vector<2x8x8xbf16> to vector<2x8x8xf32>
    %187 = vector.broadcast %182 : vector<1x1x8xf32> to vector<2x8x8xf32>
    %188 = arith.mulf %186, %187 : vector<2x8x8xf32>
    %cst_56 = arith.constant dense<0.000000e+00> : vector<2x8xf32>
    %189 = vector.multi_reduction <add>, %188, %cst_56 [2] : vector<2x8x8xf32> to vector<2x8xf32>
    %190 = vector.shape_cast %189 : vector<2x8xf32> to vector<2x8x1xf32>
    %cst_57 = arith.constant dense<0xFF800000> : vector<2x8xf32>
    %191 = vector.multi_reduction <maximumf>, %185, %cst_57 [2] : vector<2x8x8xf32> to vector<2x8xf32>
    %192 = vector.shape_cast %191 : vector<2x8xf32> to vector<2x8x1xf32>
    %193 = arith.maximumf %192, %190 : vector<2x8x1xf32>
    %194 = vector.broadcast %193 : vector<2x8x1xf32> to vector<2x8x8xf32>
    %195 = arith.subf %185, %194 : vector<2x8x8xf32>
    %196 = math.exp %195 : vector<2x8x8xf32>
    %197 = arith.subf %190, %193 : vector<2x8x1xf32>
    %198 = math.exp %197 : vector<2x8x1xf32>
    %cst_58 = arith.constant dense<0.000000e+00> : vector<2x8xf32>
    %199 = vector.multi_reduction <add>, %196, %cst_58 [2] : vector<2x8x8xf32> to vector<2x8xf32>
    %200 = vector.shape_cast %199 : vector<2x8xf32> to vector<2x8x1xf32>
    %201 = arith.addf %200, %198 : vector<2x8x1xf32>
    %202 = tpu.reciprocal %201 {approx = true} : vector<2x8x1xf32> -> vector<2x8x1xf32>
    %203 = vector.broadcast %202 : vector<2x8x1xf32> to vector<2x8x8xf32>
    %204 = arith.mulf %196, %203 : vector<2x8x8xf32>
    %205 = arith.mulf %198, %202 : vector<2x8x1xf32>
    %206 = arith.addf %165, %204 : vector<2x8x8xf32>
    %207 = arith.addf %166, %205 : vector<2x8x1xf32>
    %208 = arith.truncf %204 : vector<2x8x8xf32> to vector<2x8x8xbf16>
    "tpu.trace_start"() <{level = 10 : i32, message = "bqk,bkd->bqd"}> : () -> ()
    %cst_59 = arith.constant dense<0.000000e+00> : vector<2x8x8xf32>
    %209 = tpu.matmul %208, %180, %cst_59 {dimension_numbers = #tpu.dot_dimension_numbers<[2], [1], [1], [2], [0, 0, 0, 1, 1, 2], [0], [0]>} : vector<2x8x8xbf16>, vector<2x8x8xbf16>, vector<2x8x8xf32> -> vector<2x8x8xf32>
    "tpu.trace_stop"() : () -> ()
    %210 = vector.broadcast %205 : vector<2x8x1xf32> to vector<2x8x8xf32>
    %211 = vector.broadcast %184 : vector<1x1x8xf32> to vector<2x8x8xf32>
    %212 = arith.mulf %210, %211 : vector<2x8x8xf32>
    %213 = arith.addf %209, %212 : vector<2x8x8xf32>
    %214 = vector.shape_cast %213 : vector<2x8x8xf32> to vector<16x8xf32>
    %215 = arith.truncf %214 : vector<16x8xf32> to vector<16x8xbf16>
    %c24 = arith.constant 24 : index
    %c0_60 = arith.constant 0 : index
    %216 = vector.load %arg10[%c24, %c0_60] : memref<32x32xbf16, #tpu.memory_space<vmem>>, vector<8x32xbf16>
    %cst_61 = arith.constant dense<0.000000e+00> : vector<16x32xf32>
    %217 = tpu.matmul %215, %216, %cst_61 {dimension_numbers = #tpu.dot_dimension_numbers<[1], [0], [0], [1], [0, 0, 1, 1], [], []>} : vector<16x8xbf16>, vector<8x32xbf16>, vector<16x32xf32> -> vector<16x32xf32>
    %218 = arith.addf %177, %217 : vector<16x32xf32>
    %c0_62 = arith.constant 0 : index
    %c0_63 = arith.constant 0 : index
    %219 = vector.load %arg11[%c0_62, %c0_63] : memref<1x32xf32, #tpu.memory_space<vmem>>, vector<1x32xf32>
    %220 = vector.broadcast %219 : vector<1x32xf32> to vector<16x32xf32>
    %221 = arith.addf %218, %220 : vector<16x32xf32>
    %222 = arith.addf %1, %221 : vector<16x32xf32>
    %c0_64 = arith.constant 0 : index
    %c0_65 = arith.constant 0 : index
    %223 = vector.load %arg14[%c0_64, %c0_65] : memref<1x32xf32, #tpu.memory_space<vmem>>, vector<1x32xf32>
    %c0_66 = arith.constant 0 : index
    %c0_67 = arith.constant 0 : index
    %224 = vector.load %arg15[%c0_66, %c0_67] : memref<1x32xf32, #tpu.memory_space<vmem>>, vector<1x32xf32>
    %cst_68 = arith.constant dense<0.000000e+00> : vector<16xf32>
    %225 = vector.multi_reduction <add>, %222, %cst_68 [1] : vector<16x32xf32> to vector<16xf32>
    %226 = vector.shape_cast %225 : vector<16xf32> to vector<16x1xf32>
    %cst_69 = arith.constant 3.200000e+01 : f32
    %227 = vector.broadcast %cst_69 : f32 to vector<16x1xf32>
    %228 = arith.divf %226, %227 : vector<16x1xf32>
    %229 = vector.broadcast %228 : vector<16x1xf32> to vector<16x32xf32>
    %230 = arith.subf %222, %229 : vector<16x32xf32>
    %231 = arith.mulf %230, %230 : vector<16x32xf32>
    %cst_70 = arith.constant dense<0.000000e+00> : vector<16xf32>
    %232 = vector.multi_reduction <add>, %231, %cst_70 [1] : vector<16x32xf32> to vector<16xf32>
    %233 = vector.shape_cast %232 : vector<16xf32> to vector<16x1xf32>
    %cst_71 = arith.constant 3.200000e+01 : f32
    %234 = vector.broadcast %cst_71 : f32 to vector<16x1xf32>
    %235 = arith.divf %233, %234 : vector<16x1xf32>
    %236 = vector.broadcast %228 : vector<16x1xf32> to vector<16x32xf32>
    %237 = arith.subf %222, %236 : vector<16x32xf32>
    %cst_72 = arith.constant 9.99999974E-6 : f32
    %238 = vector.broadcast %cst_72 : f32 to vector<16x1xf32>
    %239 = arith.addf %235, %238 : vector<16x1xf32>
    %240 = math.rsqrt %239 : vector<16x1xf32>
    %241 = vector.broadcast %240 : vector<16x1xf32> to vector<16x32xf32>
    %242 = arith.mulf %237, %241 : vector<16x32xf32>
    %243 = vector.broadcast %223 : vector<1x32xf32> to vector<16x32xf32>
    %244 = arith.mulf %242, %243 : vector<16x32xf32>
    %245 = vector.broadcast %224 : vector<1x32xf32> to vector<16x32xf32>
    %246 = arith.addf %244, %245 : vector<16x32xf32>
    %247 = arith.truncf %246 : vector<16x32xf32> to vector<16x32xbf16>
    %c0_73 = arith.constant 0 : index
    %c0_74 = arith.constant 0 : index
    %248 = vector.load %arg16[%c0_73, %c0_74] : memref<32x64xbf16, #tpu.memory_space<vmem>>, vector<32x64xbf16>
    %cst_75 = arith.constant dense<0.000000e+00> : vector<16x64xf32>
    %249 = tpu.matmul %247, %248, %cst_75 {dimension_numbers = #tpu.dot_dimension_numbers<[1], [0], [0], [1], [0, 0, 1, 1], [], []>} : vector<16x32xbf16>, vector<32x64xbf16>, vector<16x64xf32> -> vector<16x64xf32>
    %c0_76 = arith.constant 0 : index
    %c0_77 = arith.constant 0 : index
    %250 = vector.load %arg17[%c0_76, %c0_77] : memref<1x64xf32, #tpu.memory_space<vmem>>, vector<1x64xf32>
    %251 = vector.broadcast %250 : vector<1x64xf32> to vector<16x64xf32>
    %252 = arith.addf %249, %251 : vector<16x64xf32>
    %cst_78 = arith.constant 5.000000e-01 : f32
    %253 = vector.broadcast %cst_78 : f32 to vector<16x64xf32>
    %254 = arith.mulf %252, %253 : vector<16x64xf32>
    %cst_79 = arith.constant 0.707106769 : f32
    %255 = vector.broadcast %cst_79 : f32 to vector<16x64xf32>
    %256 = arith.mulf %252, %255 : vector<16x64xf32>
    %257 = math.erf %256 : vector<16x64xf32>
    %cst_80 = arith.constant 1.000000e+00 : f32
    %258 = vector.broadcast %cst_80 : f32 to vector<16x64xf32>
    %259 = arith.addf %258, %257 : vector<16x64xf32>
    %260 = arith.mulf %254, %259 : vector<16x64xf32>
    %261 = arith.truncf %260 : vector<16x64xf32> to vector<16x64xbf16>
    %c0_81 = arith.constant 0 : index
    %c0_82 = arith.constant 0 : index
    %262 = vector.load %arg18[%c0_81, %c0_82] : memref<64x32xbf16, #tpu.memory_space<vmem>>, vector<64x32xbf16>
    %cst_83 = arith.constant dense<0.000000e+00> : vector<16x32xf32>
    %263 = tpu.matmul %261, %262, %cst_83 {dimension_numbers = #tpu.dot_dimension_numbers<[1], [0], [0], [1], [0, 0, 1, 1], [], []>} : vector<16x64xbf16>, vector<64x32xbf16>, vector<16x32xf32> -> vector<16x32xf32>
    %c0_84 = arith.constant 0 : index
    %c0_85 = arith.constant 0 : index
    %264 = vector.load %arg19[%c0_84, %c0_85] : memref<1x32xf32, #tpu.memory_space<vmem>>, vector<1x32xf32>
    %265 = vector.broadcast %264 : vector<1x32xf32> to vector<16x32xf32>
    %266 = arith.addf %263, %265 : vector<16x32xf32>
    %267 = arith.addf %222, %266 : vector<16x32xf32>
    %268 = vector.shape_cast %267 : vector<16x32xf32> to vector<2x8x32xf32>
    %c0_86 = arith.constant 0 : index
    %c0_87 = arith.constant 0 : index
    %c0_88 = arith.constant 0 : index
    %269 = vector.load %arg20[%c0_86, %c0_87, %c0_88] : memref<2x8x32xf32, #tpu.memory_space<vmem>>, vector<2x8x32xf32>
    tpu.vector_store %arg20[%c0_86, %c0_87, %c0_88], %268 {strides = array<i32>} : memref<2x8x32xf32, #tpu.memory_space<vmem>>, vector<2x8x32xf32>,
    %cst_89 = arith.constant 2.500000e-01 : f32
    %270 = vector.broadcast %cst_89 : f32 to vector<2x8x8xf32>
    %271 = arith.mulf %206, %270 : vector<2x8x8xf32>
    %c0_90 = arith.constant 0 : index
    %c0_91 = arith.constant 0 : index
    %c0_92 = arith.constant 0 : index
    %272 = vector.load %arg21[%c0_90, %c0_91, %c0_92] : memref<2x8x128xf32, #tpu.memory_space<vmem>>, vector<2x8x8xf32>
    tpu.vector_store %arg21[%c0_90, %c0_91, %c0_92], %271 {strides = array<i32>} : memref<2x8x128xf32, #tpu.memory_space<vmem>>, vector<2x8x8xf32>,
    %cst_93 = arith.constant 2.500000e-01 : f32
    %273 = vector.broadcast %cst_93 : f32 to vector<2x8x1xf32>
    %274 = arith.mulf %207, %273 : vector<2x8x1xf32>
    %c0_94 = arith.constant 0 : index
    %c0_95 = arith.constant 0 : index
    %c8_96 = arith.constant 8 : index
    %275 = vector.load %arg21[%c0_94, %c0_95, %c8_96] : memref<2x8x128xf32, #tpu.memory_space<vmem>>, vector<2x8x1xf32>
    tpu.vector_store %arg21[%c0_94, %c0_95, %c8_96], %274 {strides = array<i32>} : memref<2x8x128xf32, #tpu.memory_space<vmem>>, vector<2x8x1xf32>,
    return
  }
  func.func @transform_0(%arg0: i32) -> (i32, i32, i32) {
    %c0_i32 = arith.constant 0 : i32
    %c0_i32_0 = arith.constant 0 : i32
    %c0_i32_1 = arith.constant 0 : i32
    return %arg0, %c0_i32, %c0_i32_0 : i32, i32, i32
  }
  func.func @transform_1(%arg0: i32) -> (i32, i32) {
    %c0_i32 = arith.constant 0 : i32
    %c0_i32_0 = arith.constant 0 : i32
    %c0_i32_1 = arith.constant 0 : i32
    return %c0_i32, %c0_i32_0 : i32, i32
  }
  func.func @transform_2(%arg0: i32) -> (i32, i32) {
    %c0_i32 = arith.constant 0 : i32
    %c0_i32_0 = arith.constant 0 : i32
    %c0_i32_1 = arith.constant 0 : i32
    return %c0_i32, %c0_i32_0 : i32, i32
  }
  func.func @transform_3(%arg0: i32) -> (i32, i32) {
    %c0_i32 = arith.constant 0 : i32
    %c0_i32_0 = arith.constant 0 : i32
    %c0_i32_1 = arith.constant 0 : i32
    return %c0_i32, %c0_i32_0 : i32, i32
  }
  func.func @transform_4(%arg0: i32) -> (i32, i32) {
    %c0_i32 = arith.constant 0 : i32
    %c0_i32_0 = arith.constant 0 : i32
    %c0_i32_1 = arith.constant 0 : i32
    return %c0_i32, %c0_i32_0 : i32, i32
  }
  func.func @transform_5(%arg0: i32) -> (i32, i32) {
    %c0_i32 = arith.constant 0 : i32
    %c0_i32_0 = arith.constant 0 : i32
    %c0_i32_1 = arith.constant 0 : i32
    return %c0_i32, %c0_i32_0 : i32, i32
  }
  func.func @transform_6(%arg0: i32) -> (i32, i32) {
    %c0_i32 = arith.constant 0 : i32
    %c0_i32_0 = arith.constant 0 : i32
    %c0_i32_1 = arith.constant 0 : i32
    return %c0_i32, %c0_i32_0 : i32, i32
  }
  func.func @transform_7(%arg0: i32) -> (i32, i32) {
    %c0_i32 = arith.constant 0 : i32
    %c0_i32_0 = arith.constant 0 : i32
    %c0_i32_1 = arith.constant 0 : i32
    return %c0_i32, %c0_i32_0 : i32, i32
  }
  func.func @transform_8(%arg0: i32) -> (i32, i32) {
    %c0_i32 = arith.constant 0 : i32
    %c0_i32_0 = arith.constant 0 : i32
    %c0_i32_1 = arith.constant 0 : i32
    return %c0_i32, %c0_i32_0 : i32, i32
  }
  func.func @transform_9(%arg0: i32) -> (i32, i32) {
    %c0_i32 = arith.constant 0 : i32
    %c0_i32_0 = arith.constant 0 : i32
    %c0_i32_1 = arith.constant 0 : i32
    return %c0_i32, %c0_i32_0 : i32, i32
  }
  func.func @transform_10(%arg0: i32) -> (i32, i32) {
    %c0_i32 = arith.constant 0 : i32
    %c0_i32_0 = arith.constant 0 : i32
    %c0_i32_1 = arith.constant 0 : i32
    return %c0_i32, %c0_i32_0 : i32, i32
  }
  func.func @transform_11(%arg0: i32) -> (i32, i32) {
    %c0_i32 = arith.constant 0 : i32
    %c0_i32_0 = arith.constant 0 : i32
    %c0_i32_1 = arith.constant 0 : i32
    return %c0_i32, %c0_i32_0 : i32, i32
  }
  func.func @transform_12(%arg0: i32) -> (i32, i32) {
    %c0_i32 = arith.constant 0 : i32
    %c0_i32_0 = arith.constant 0 : i32
    %c0_i32_1 = arith.constant 0 : i32
    return %c0_i32, %c0_i32_0 : i32, i32
  }
  func.func @transform_13(%arg0: i32) -> (i32, i32) {
    %c0_i32 = arith.constant 0 : i32
    %c0_i32_0 = arith.constant 0 : i32
    %c0_i32_1 = arith.constant 0 : i32
    return %c0_i32, %c0_i32_0 : i32, i32
  }
  func.func @transform_14(%arg0: i32) -> (i32, i32) {
    %c0_i32 = arith.constant 0 : i32
    %c0_i32_0 = arith.constant 0 : i32
    %c0_i32_1 = arith.constant 0 : i32
    return %c0_i32, %c0_i32_0 : i32, i32
  }
  func.func @transform_15(%arg0: i32) -> (i32, i32) {
    %c0_i32 = arith.constant 0 : i32
    %c0_i32_0 = arith.constant 0 : i32
    %c0_i32_1 = arith.constant 0 : i32
    return %c0_i32, %c0_i32_0 : i32, i32
  }
  func.func @transform_16(%arg0: i32) -> (i32, i32) {
    %c0_i32 = arith.constant 0 : i32
    %c0_i32_0 = arith.constant 0 : i32
    %c0_i32_1 = arith.constant 0 : i32
    return %c0_i32, %c0_i32_0 : i32, i32
  }
  func.func @transform_17(%arg0: i32) -> (i32, i32) {
    %c0_i32 = arith.constant 0 : i32
    %c0_i32_0 = arith.constant 0 : i32
    %c0_i32_1 = arith.constant 0 : i32
    return %c0_i32, %c0_i32_0 : i32, i32
  }
  func.func @transform_18(%arg0: i32) -> (i32, i32) {
    %c0_i32 = arith.constant 0 : i32
    %c0_i32_0 = arith.constant 0 : i32
    %c0_i32_1 = arith.constant 0 : i32
    return %c0_i32, %c0_i32_0 : i32, i32
  }
  func.func @transform_19(%arg0: i32) -> (i32, i32, i32) {
    %c0_i32 = arith.constant 0 : i32
    %c0_i32_0 = arith.constant 0 : i32
    %c0_i32_1 = arith.constant 0 : i32
    return %arg0, %c0_i32, %c0_i32_0 : i32, i32, i32
  }
  func.func @transform_20(%arg0: i32) -> (i32, i32, i32) {
    %c0_i32 = arith.constant 0 : i32
    %c0_i32_0 = arith.constant 0 : i32
    %c0_i32_1 = arith.constant 0 : i32
    return %arg0, %c0_i32, %c0_i32_0 : i32, i32, i32
  }
}

</mosaic_0001>

<bundles_post_ra>
// kernel: transformer_encoder_layer.1
= control target key start
LH: loop header
LB: loop body
LE: loop exit
PB: predicated region body
PF: predicated region fallthrough
CT: control target
= control target key end

     0   :  { %s2757_s0 = inlined_call_operand.vmem [shape: f32[2,8,32], index: 0, kind: input, shape index: {}]   ;;  %s2758_s1 = inlined_call_operand.vmem [shape: bf16[32,32], index: 1, kind: input, shape index: {}]   ;;  %s2759_s2 = inlined_call_operand.vmem [shape: f32[1,32], index: 2, kind: input, shape index: {}]   ;;  %s2760_s3 = inlined_call_operand.vmem [shape: bf16[32,32], index: 3, kind: input, shape index: {}]   ;;  %s2761_s4 = inlined_call_operand.vmem [shape: f32[1,32], index: 4, kind: input, shape index: {}]   ;;  %s2762_s5 = inlined_call_operand.vmem [shape: bf16[32,32], index: 5, kind: input, shape index: {}]   ;;  %s2763_s6 = inlined_call_operand.vmem [shape: f32[1,32], index: 6, kind: input, shape index: {}]   ;;  %s2764_s7 = inlined_call_operand.vmem [shape: f32[1,32], index: 7, kind: input, shape index: {}]   ;;  %s2765_s8 = inlined_call_operand.vmem [shape: f32[1,32], index: 8, kind: input, shape index: {}]   ;;  %s2766_s9 = inlined_call_operand.vmem [shape: bf16[32,32], index: 9, kind: input, shape index: {}]   ;;  %s2767_s10 = inlined_call_operand.vmem [shape: f32[1,32], index: 10, kind: input, shape index: {}]   ;;  %s2768_s11 = inlined_call_operand.vmem [shape: f32[1,32], index: 11, kind: input, shape index: {}]   ;;  %s2769_s12 = inlined_call_operand.vmem [shape: f32[1,32], index: 12, kind: input, shape index: {}]   ;;  %s2770_s13 = inlined_call_operand.vmem [shape: f32[1,32], index: 13, kind: input, shape index: {}]   ;;  %s2771_s14 = inlined_call_operand.vmem [shape: f32[1,32], index: 14, kind: input, shape index: {}]   ;;  %s2772_s15 = inlined_call_operand.vmem [shape: bf16[32,64], index: 15, kind: input, shape index: {}]   ;;  %s2773_s16 = inlined_call_operand.vmem [shape: f32[1,64], index: 16, kind: input, shape index: {}]   ;;  %s2774_s17 = inlined_call_operand.vmem [shape: bf16[64,32], index: 17, kind: input, shape index: {}]   ;;  %s2775_s18 = inlined_call_operand.vmem [shape: f32[1,32], index: 18, kind: input, shape index: {}]   ;;  %s2776_s19 = inlined_call_operand.vmem [shape: f32[2,8,32], index: 19, kind: output, shape index: {0}]   ;;  %s2777_s20 = inlined_call_operand.hbm [shape: f32[2,8,128], index: 20, kind: output, shape index: {1}]  }
   0x1   :  { %2781 = sst [smem:[#allocation5_spill]] %s2757_s0 }
   0x2   :  { %2782 = sst [smem:[#allocation6_spill]] %s2758_s1 }
   0x3   :  { %2783 = sst [smem:[#allocation7_spill]] %s2759_s2 }
   0x4   :  { %2784 = sst [smem:[#allocation8_spill]] %s2760_s3 }
   0x5   :  { %2785 = sst [smem:[#allocation9_spill]] %s2761_s4 }
   0x6   :  { %s2786_s23 = sld [smem:[#allocation5_spill]]  ;;  %vm70_vm0 = vcmask 261120  }
   0xc   :  { %v66_v0 = vld [vmem:[%s2786_s23] sm:$0xff]  ;;  %v67_v1 = vld [vmem:[%s2786_s23 + $0x8] sm:$0xff] }
   0xd   :  { %v71_v2 = vsel %vm70_vm0, %v66_v0, 0.0  ;;  %v74_v3 = vsel %vm70_vm0, %v67_v1, 0.0 }
   0xe   :  { %72 = vadd.xlane.f32.xlu0 %v71_v2 }
  0x12   :  { %75 = vadd.xlane.f32.xlu0 %v74_v3 }
  0x13   :  { %26 = vsyncpa [#allocation3], 0  ;;  %s2787_s26 = sld [smem:[#allocation6_spill]]  ;;  %v2102_v15 = vld [vmem:[%s2762_s5 + $0x8] sm:$0xff]   ;;  %v2197_v16 = vmov 0.0   ;;  %v2104_v18 = vld [vmem:[%s2762_s5] sm:$0xff]  }
  0x14   :  { %1929 = vmatprep.subr.bf16.mxu1 %v2197_v16  ;;  %1945 = vmatprep.subr.bf16.mxu0 %v2197_v16  ;;  %vm2198_vm1 = vmmov 0   ;;  %v1811_v27 = vld [vmem:[%s2768_s11] ss:$0 sm:$0xff]  ;;  %s2788_s25 = sld [smem:[#allocation8_spill]]  ;;  %vm334_vm2 = vcmask 64512   ;;  %vm494_vm3 = vcmask 1043456  }
  0x15   :  { %1946 = vmatpush3.bf16.msra.mxu0 %v2102_v15  ;;  %1933 = vmatprep.mubr.msk.bf16.mxu1 %vm2198_vm1, %v2197_v16  ;;  %v1812_v31 = vld [vmem:[%s2769_s12] ss:$0 sm:$0xff]  ;;  %s2789_s27 = sld [smem:[#allocation7_spill]]  ;;  %s2201_s11 = smov 104   ;;  %vm1788_vm4 = vcmask 72768   ;;  %vm1733_vm5 = vcmask 523264  }
  0x16   :  { %1947 = vmatprep.subr.bf16.mxu0 %v2197_v16  ;;  %1949 = vmatprep.mubr.msk.bf16.mxu0 %vm2198_vm1, %v2197_v16  ;;  %s2790_s29 = sld [smem:[#allocation9_spill]]  ;;  %v1833_v52 = vld [vmem:[%s2764_s7] ss:$0 sm:$0xff] }
  0x17   :  { %v1821_v59 = vld [vmem:[%s2763_s6] ss:$0 sm:$0xff]  ;;  %s2199_s6 = smov 120  }
  0x19   :  { %v2101_v14 = vld [vmem:[%s2787_s26 + $0x8] sm:$0xff]   ;;  %v2103_v17 = vld [vmem:[%s2787_s26] sm:$0xff]   ;;  %1948 = vmatpush3.bf16.msra.mxu0 %v2104_v18 }
  0x1a   :  { %1930 = vmatpush3.bf16.msra.mxu1 %v2101_v14  ;;  %1959 = vmatprep.subr.bf16.mxu0 %v2197_v16  ;;  %v2105_v35 = vld [vmem:[%s2788_s25 + $0x8] sm:$0xff]   ;;  %v2106_v37 = vld [vmem:[%s2788_s25] sm:$0xff]  }
  0x1b   :  { %1931 = vmatprep.subr.bf16.mxu1 %v2197_v16  ;;  %v1813_v38 = vld [vmem:[%s2789_s27] ss:$0 sm:$0xff] }
  0x1c   :  { %v1817_v51 = vld [vmem:[%s2790_s29] ss:$0 sm:$0xff] }
  0x1e   :  { %1932 = vmatpush3.bf16.msra.mxu1 %v2103_v17 }
  0x1f   :  { %1937 = vmatprep.subr.bf16.mxu1 %v2197_v16 }
  0x97   :  { %v73_v4 = vpop.xlane.xlu0 %72 }
  0x98   :  { %v78_v5 = vmul.f32 0.03125, %v73_v4 }
  0x9a   :  { %v80_v6 = vsub.f32 %v66_v0, %v78_v5 }
  0x9b   :  { %v76_v7 = vpop.xlane.xlu0 %75 }
  0x9c   :  { %v79_v8 = vmul.f32 0.03125, %v76_v7  ;;  %v82_v9 = vmul.f32 %v80_v6, %v80_v6 }
  0x9e   :  { %v81_v10 = vsub.f32 %v67_v1, %v79_v8  ;;  %v84_v11 = vsel %vm70_vm0, %v82_v9, 0.0 }
  0x9f   :  { %85 = vadd.xlane.f32.xlu1 %v84_v11 }
  0xa0   :  { %v83_v12 = vmul.f32 %v81_v10, %v81_v10 }
  0xa2   :  { %v87_v13 = vsel %vm70_vm0, %v83_v12, 0.0 }
  0xa3   :  { %88 = vadd.xlane.f32.xlu1 %v87_v13 }
 0x128   :  { %v86_v19 = vpop.xlane.xlu1 %85 }
 0x129   :  { %v90_v20 = vmul.f32 0.03125, %v86_v19 }
 0x12b   :  { %v92_v21 = vadd.f32 1e-05, %v90_v20 }
 0x12c   :  { %v89_v22 = vpop.xlane.xlu1 %88 }
 0x12d   :  { %2113 = vrsqrt.f32 %v92_v21  ;;  %v91_v23 = vmul.f32 0.03125, %v89_v22 }
 0x12f   :  { %v93_v24 = vadd.f32 1e-05, %v91_v23 }
 0x131   :  { %2115 = vrsqrt.f32 %v93_v24 }
 0x13a   :  { %v2114_v25 = vpop.eup %2113 }
 0x13b   :  { %v96_v26 = vmul.f32 %v2114_v25, %v80_v6 }
 0x13d   :  { %v104_v30 = vmul.f32 %v1811_v27, %v96_v26 }
 0x13e   :  { %v2116_v28 = vpop.eup %2115 }
 0x13f   :  { %v97_v29 = vmul.f32 %v2116_v28, %v81_v10  ;;  %v112_v33 = vadd.f32 %v1812_v31, %v104_v30 }
 0x141   :  { %v105_v32 = vmul.f32 %v1811_v27, %v97_v29 }
 0x143   :  { %v113_v34 = vadd.f32 %v1812_v31, %v105_v32 }
 0x145   :  { %v114_v36 = vpack.c.bf16 %v113_v34, %v112_v33 }
 0x147   :  { %1934 = vmatmul.mubr.msk.bf16.vlgmr.msra.gmra.mxu1 %vm70_vm0, %v114_v36  ;;  %1950 = vmatmul.mubr.msk.bf16.vlgmr.msra.gmra.mxu0 %vm70_vm0, %v114_v36 }
 0x148   :  { %1938 = vmatpush3.bf16.msra.mxu1 %v2105_v35  ;;  %1941 = vmatprep.mubr.msk.bf16.mxu1 %vm2198_vm1, %v2197_v16 }
 0x149   :  { %1939 = vmatprep.subr.bf16.mxu1 %v2197_v16  ;;  %1961 = vmatprep.mubr.msk.bf16.mxu0 %vm2198_vm1, %v2197_v16 }
 0x14c   :  { %1940 = vmatpush3.bf16.msra.mxu1 %v2106_v37 }
 0x14d   :  { %1953 = vmatprep.subr.bf16.mxu1 %v2197_v16 }
 0x14f   :  { %1942 = vmatmul.mubr.msk.bf16.vlgmr.msra.gmra.mxu1 %vm70_vm0, %v114_v36 }
 0x150   :  { %1955 = vmatprep.mubr.msk.bf16.mxu1 %vm2198_vm1, %v2197_v16 }
 0x207   :  { %v175_v39 = vpop.f32.mrf.mxu1  ;;  %v305_v40 = vpop.f32.mrf.mxu0 }
 0x208   :  { %v176_v41 = vadd.f32 %v1813_v38, %v175_v39  ;;  %v306_v1 = vadd.f32 %v1821_v59, %v305_v40 }
 0x209   :  { %v1935_v42 = vpop.f32.mrf.mxu1  ;;  %v1951_v43 = vpop.f32.mrf.mxu0 }
 0x20a   :  { %v182_v44 = vmul.f32 0.35355338, %v176_v41  ;;  %v2398_v8 = vpack.c.bf16 %v306_v1, %v306_v1 }
 0x20b   :  { %v178_v45 = vpop.f32.mrf.mxu1  ;;  %v308_v46 = vpop.f32.mrf.mxu0 }
 0x20c   :  { %v2368_v47 = vpack.c.bf16 %v182_v44, %v182_v44  ;;  %v179_v48 = vadd.f32 %v1813_v38, %v178_v45  ;;  %v309_v9 = vadd.f32 %v1821_v59, %v308_v46  ;;  %v496_v12 = vsel %vm494_vm3, %v2398_v8, 0 }
 0x20d   :  { %v1936_v49 = vpop.f32.mrf.mxu1  ;;  %v1952_v50 = vpop.f32.mrf.mxu0 }
 0x20e   :  { %v183_v53 = vmul.f32 0.35355338, %v179_v48  ;;  %v427_v54 = vunpack.c.l.bf16 %v2368_v47  ;;  %v2403_v11 = vpack.c.bf16 %v309_v9, %v309_v9 }
 0x20f   :  { %v241_v55 = vpop.f32.mrf.mxu1 }
 0x210   :  { %v2377_v56 = vpack.c.bf16 %v183_v53, %v183_v53  ;;  %v242_v57 = vadd.f32 %v1817_v51, %v241_v55  ;;  %v2379_v58 = vmul.f32 %v1833_v52, %v427_v54  ;;  %v542_v13 = vsel %vm494_vm3, %v2403_v11, 0 }
 0x211   :  { %v1943_v60 = vpop.f32.mrf.mxu1 }
 0x212   :  { %v2384_v61 = vpack.c.bf16 %v242_v57, %v242_v57  ;;  %v437_v62 = vsel %vm334_vm2, %v2379_v58, 0.0  ;;  %v428_v63 = vunpack.c.l.bf16 %v2377_v56 }
 0x213   :  { %438 = vadd.xlane.f32.xlu0 %v437_v62  ;;  %v244_v0 = vpop.f32.mrf.mxu1 }
 0x214   :  { %v245_v2 = vadd.f32 %v1817_v51, %v244_v0  ;;  %v339_v3 = vsel %vm334_vm2, %v2384_v61, 0  ;;  %v2391_v4 = vmul.f32 %v1833_v52, %v428_v63 }
 0x215   :  { %v1944_v5 = vpop.f32.mrf.mxu1  ;;  %1954 = vmatpush3.bf16.xpose.msra.mxu1 %v339_v3 }
 0x216   :  { %v2393_v6 = vpack.c.bf16 %v245_v2, %v245_v2  ;;  %v440_v7 = vsel %vm334_vm2, %v2391_v4, 0.0  ;;  %1965 = vmatprep.subr.bf16.mxu1 %v2197_v16 }
 0x217   :  { %441 = vadd.xlane.f32.xlu1 %v440_v7 }
 0x218   :  { %v385_v10 = vsel %vm334_vm2, %v2393_v6, 0 }
 0x219   :  { %1960 = vmatpush3.bf16.xpose.msra.mxu0 %v385_v10  ;;  %v2468_v10 = vld [vmem:[%s2765_s8] ss:$0 sm:$0xff]  ;;  %s2200_s8 = smov 112  }
 0x21a   :  { %1971 = vmatprep.subr.bf16.mxu0 %v2197_v16 }
 0x21c   :  { %1956 = vmatmul.mubr.msk.bf16.vlgmr.msra.gmra.mxu1 %vm334_vm2, %v2368_v47 }
 0x21d   :  { %1966 = vmatpush3.bf16.msra.mxu1 %v496_v12  ;;  %1967 = vmatprep.mubr.msk.bf16.mxu1 %vm2198_vm1, %v2197_v16 }
 0x21e   :  { %1977 = vmatprep.subr.bf16.mxu1 %v2197_v16 }
 0x220   :  { %1962 = vmatmul.mubr.msk.bf16.vlgmr.msra.gmra.mxu0 %vm334_vm2, %v2377_v56 }
 0x221   :  { %1972 = vmatpush3.bf16.msra.mxu0 %v542_v13  ;;  %1973 = vmatprep.mubr.msk.bf16.mxu0 %vm2198_vm1, %v2197_v16 }
 0x222   :  { %1983 = vmatprep.subr.bf16.mxu0 %v2197_v16 }
 0x29c   :  { %v439_v25 = vpop.xlane.xlu0 %438 }
 0x2a0   :  { %v442_v26 = vpop.xlane.xlu1 %441 }
 0x2dc   :  { %v375_v14 = vpop.f32.mrf.mxu1 }
 0x2dd   :  { %v443_v15 = vsel %vm334_vm2, %v375_v14, -inf }
 0x2de   :  { %444 = vmax.xlane.f32.xlu0 %v443_v15  ;;  %v1957_v17 = vpop.f32.mrf.mxu1 }
 0x2e0   :  { %v378_v18 = vpop.f32.mrf.mxu1  ;;  %v421_v19 = vpop.f32.mrf.mxu0 }
 0x2e1   :  { %v446_v20 = vsel %vm334_vm2, %v421_v19, -inf }
 0x2e2   :  { %447 = vmax.xlane.f32.xlu1 %v446_v20  ;;  %v1958_v21 = vpop.f32.mrf.mxu1  ;;  %v1963_v22 = vpop.f32.mrf.mxu0 }
 0x2e4   :  { %v424_v23 = vpop.f32.mrf.mxu0 }
 0x2e6   :  { %v1964_v24 = vpop.f32.mrf.mxu0 }
 0x2f3   :  { %638 = vrot.lane.b32.xlu1 %v2393_v6, %s2199_s6 }
 0x367   :  { %v445_v27 = vpop.xlane.xlu0 %444 }
 0x368   :  { %v449_v28 = vmax.f32 %v445_v27, %v439_v25 }
 0x36a   :  { %v451_v29 = vsub.f32 %v375_v14, %v449_v28  ;;  %v457_v30 = vsub.f32 %v439_v25, %v449_v28 }
 0x36b   :  { %v448_v31 = vpop.xlane.xlu1 %447 }
 0x36c   :  { %v453_v32 = vmul.f32 1.442695, %v451_v29  ;;  %v450_v33 = vmax.f32 %v448_v31, %v442_v26  ;;  %v459_v41 = vmul.f32 1.442695, %v457_v30 }
 0x36e   :  { %2117 = vpow2.f32 %v453_v32  ;;  %v452_v34 = vsub.f32 %v421_v19, %v450_v33  ;;  %v458_v35 = vsub.f32 %v442_v26, %v450_v33 }
 0x36f   :  { %v639_v44 = vpop.permute.xlu1 %638 }
 0x370   :  { %v455_v36 = vmul.f32 1.442695, %v452_v34  ;;  %v461_v42 = vmul.f32 1.442695, %v458_v35  ;;  %v644_v9 = vsel %vm334_vm2, %v639_v44, 0 }
 0x372   :  { %2119 = vpow2.f32 %v455_v36 }
 0x373   :  { %2121 = vpow2.f32 %v459_v41 }
 0x374   :  { %2123 = vpow2.f32 %v461_v42 }
 0x37b   :  { %v2118_v37 = vpop.eup %2117 }
 0x37c   :  { %v463_v38 = vsel %vm334_vm2, %v2118_v37, 0.0 }
 0x37d   :  { %464 = vadd.xlane.f32.xlu0 %v463_v38 }
 0x37f   :  { %v2120_v39 = vpop.eup %2119 }
 0x380   :  { %v466_v40 = vsel %vm334_vm2, %v2120_v39, 0.0  ;;  %v2122_v43 = vpop.eup %2121 }
 0x381   :  { %467 = vadd.xlane.f32.xlu1 %v466_v40  ;;  %v2124_v48 = vpop.eup %2123 }
 0x392   :  { %586 = vrot.lane.b32.xlu1 %v2368_v47, %s2199_s6 }
 0x393   :  { %588 = vrot.lane.b32.xlu0 %v2384_v61, %s2199_s6 }
 0x396   :  { %636 = vrot.lane.b32.xlu1 %v2377_v56, %s2199_s6 }
 0x397   :  { %688 = vrot.lane.b32.xlu0 %v2379_v58, %s2199_s6 }
 0x39a   :  { %690 = vrot.lane.b32.xlu1 %v2391_v4, %s2199_s6 }
 0x406   :  { %v465_v45 = vpop.xlane.xlu0 %464 }
 0x407   :  { %v469_v46 = vadd.f32 %v2122_v43, %v465_v45 }
 0x409   :  { %2125 = vrcp.f32 %v469_v46 }
 0x40a   :  { %v468_v49 = vpop.xlane.xlu1 %467  ;;  %v589_v50 = vpop.permute.xlu0 %588 }
 0x40b   :  { %v470_v51 = vadd.f32 %v2124_v48, %v468_v49  ;;  %v594_v2 = vsel %vm334_vm2, %v589_v50, 0 }
 0x40d   :  { %2127 = vrcp.f32 %v470_v51 }
 0x40e   :  { %v587_v52 = vpop.permute.xlu1 %586  ;;  %v689_v53 = vpop.permute.xlu0 %688 }
 0x40f   :  { %v694_v54 = vsel %vm334_vm2, %v689_v53, 0.0 }
 0x410   :  { %695 = vadd.xlane.f32.xlu0 %v694_v54 }
 0x412   :  { %v637_v55 = vpop.permute.xlu1 %636 }
 0x416   :  { %v2126_v57 = vpop.eup %2125  ;;  %v691_v59 = vpop.permute.xlu1 %690 }
 0x417   :  { %v697_v60 = vsel %vm334_vm2, %v691_v59, 0.0  ;;  %v2437_v62 = vmul.f32 %v2126_v57, %v2118_v37  ;;  %v2439_v63 = vmul.f32 %v2126_v57, %v2122_v43 }
 0x418   :  { %698 = vadd.xlane.f32.xlu1 %v697_v60 }
 0x419   :  { %v481_v0 = vpack.c.bf16 %v2437_v62, %v2437_v62  ;;  %v489_v14 = vmul.f32 %v2468_v10, %v2439_v63 }
 0x41a   :  { %v2128_v1 = vpop.eup %2127 }
 0x41b   :  { %1968 = vmatmul.mubr.msk.bf16.vlgmr.msra.gmra.mxu1 %vm334_vm2, %v481_v0  ;;  %v2445_v3 = vmul.f32 %v2128_v1, %v2120_v39  ;;  %v2447_v5 = vmul.f32 %v2128_v1, %v2124_v48 }
 0x41c   :  { %1978 = vmatpush3.bf16.xpose.msra.mxu1 %v594_v2  ;;  %1979 = vmatprep.mubr.msk.bf16.mxu1 %vm2198_vm1, %v2197_v16 }
 0x41d   :  { %v482_v7 = vpack.c.bf16 %v2445_v3, %v2445_v3  ;;  %1989 = vmatprep.subr.bf16.mxu1 %v2197_v16  ;;  %v490_v15 = vmul.f32 %v2468_v10, %v2447_v5 }
 0x41f   :  { %1974 = vmatmul.mubr.msk.bf16.vlgmr.msra.gmra.mxu0 %vm334_vm2, %v482_v7 }
 0x420   :  { %1984 = vmatpush3.bf16.xpose.msra.mxu0 %v644_v9  ;;  %1985 = vmatprep.mubr.msk.bf16.mxu0 %vm2198_vm1, %v2197_v16 }
 0x421   :  { %1995 = vmatprep.subr.bf16.mxu0 %v2197_v16 }
 0x423   :  { %1980 = vmatmul.mubr.msk.bf16.vlgmr.msra.gmra.mxu1 %vm334_vm2, %v587_v52 }
 0x424   :  { %1991 = vmatprep.mubr.msk.bf16.mxu1 %vm2198_vm1, %v2197_v16 }
 0x427   :  { %1986 = vmatmul.mubr.msk.bf16.vlgmr.msra.gmra.mxu0 %vm334_vm2, %v637_v55 }
 0x428   :  { %1997 = vmatprep.mubr.msk.bf16.mxu0 %vm2198_vm1, %v2197_v16 }
 0x499   :  { %v696_v36 = vpop.xlane.xlu0 %695 }
 0x4a1   :  { %v699_v41 = vpop.xlane.xlu1 %698 }
 0x4db   :  { %v532_v12 = vpop.f32.mrf.mxu1 }
 0x4dc   :  { %v2474_v19 = vadd.f32 %v532_v12, %v489_v14 }
 0x4dd   :  { %v1969_v13 = vpop.f32.mrf.mxu1 }
 0x4df   :  { %v535_v17 = vpop.f32.mrf.mxu1  ;;  %v578_v18 = vpop.f32.mrf.mxu0 }
 0x4e0   :  { %v2476_v20 = vadd.f32 %v578_v18, %v490_v15 }
 0x4e1   :  { %v1970_v21 = vpop.f32.mrf.mxu1  ;;  %v1975_v22 = vpop.f32.mrf.mxu0 }
 0x4e2   :  { %v584_v23 = vpack.c.bf16 %v2476_v20, %v2474_v19 }
 0x4e3   :  { %v581_v24 = vpop.f32.mrf.mxu0  ;;  %v630_v25 = vpop.f32.mrf.mxu1 }
 0x4e4   :  { %v700_v26 = vsel %vm334_vm2, %v630_v25, -inf }
 0x4e5   :  { %v1976_v27 = vpop.f32.mrf.mxu0  ;;  %701 = vmax.xlane.f32.xlu0 %v700_v26  ;;  %v1981_v28 = vpop.f32.mrf.mxu1 }
 0x4e6   :  { %v585_v27 = vld [vmem:[%s2766_s9] sm:$0xf] }
 0x4e7   :  { %v633_v29 = vpop.f32.mrf.mxu1  ;;  %v680_v30 = vpop.f32.mrf.mxu0 }
 0x4e8   :  { %v703_v31 = vsel %vm334_vm2, %v680_v30, -inf }
 0x4e9   :  { %v1987_v32 = vpop.f32.mrf.mxu0  ;;  %704 = vmax.xlane.f32.xlu0 %v703_v31  ;;  %v1982_v33 = vpop.f32.mrf.mxu1 }
 0x4ea   :  { %v899_v32 = vsel %vm494_vm3, %v585_v27, 0  ;;  %v847_v33 = vld [vmem:[%s2766_s9 + $0x4] sm:$0xf] }
 0x4eb   :  { %v683_v34 = vpop.f32.mrf.mxu0 }
 0x4ec   :  { %v852_v34 = vsel %vm494_vm3, %v847_v33, 0 }
 0x4ed   :  { %v1988_v35 = vpop.f32.mrf.mxu0 }
 0x56e   :  { %v702_v37 = vpop.xlane.xlu0 %701 }
 0x56f   :  { %v706_v38 = vmax.f32 %v702_v37, %v696_v36 }
 0x571   :  { %v708_v39 = vsub.f32 %v630_v25, %v706_v38  ;;  %v714_v40 = vsub.f32 %v696_v36, %v706_v38 }
 0x572   :  { %v705_v42 = vpop.xlane.xlu0 %704 }
 0x573   :  { %v710_v43 = vmul.f32 1.442695, %v708_v39  ;;  %v707_v44 = vmax.f32 %v705_v42, %v699_v41  ;;  %v716_v52 = vmul.f32 1.442695, %v714_v40 }
 0x575   :  { %2129 = vpow2.f32 %v710_v43  ;;  %v709_v45 = vsub.f32 %v680_v30, %v707_v44  ;;  %v715_v53 = vsub.f32 %v699_v41, %v707_v44 }
 0x577   :  { %v712_v46 = vmul.f32 1.442695, %v709_v45  ;;  %v718_v54 = vmul.f32 1.442695, %v715_v53 }
 0x579   :  { %2131 = vpow2.f32 %v712_v46 }
 0x57a   :  { %2133 = vpow2.f32 %v716_v52 }
 0x57b   :  { %2135 = vpow2.f32 %v718_v54 }
 0x582   :  { %v2130_v48 = vpop.eup %2129 }
 0x583   :  { %v720_v49 = vsel %vm334_vm2, %v2130_v48, 0.0 }
 0x584   :  { %721 = vadd.xlane.f32.xlu0 %v720_v49 }
 0x586   :  { %v2132_v50 = vpop.eup %2131 }
 0x587   :  { %v723_v51 = vsel %vm334_vm2, %v2132_v50, 0.0  ;;  %v2134_v55 = vpop.eup %2133 }
 0x588   :  { %724 = vadd.xlane.f32.xlu1 %v723_v51  ;;  %v2136_v60 = vpop.eup %2135 }
 0x599   :  { %794 = vrot.lane.b32.xlu1 %v2403_v11, %s2199_s6 }
 0x59a   :  { %742 = vrot.lane.b32.xlu0 %v2398_v8, %s2199_s6 }
 0x59e   :  { %944 = vrot.lane.b32.xlu0 %v2384_v61, %s2200_s8 }
 0x5a2   :  { %942 = vrot.lane.b32.xlu0 %v2368_v47, %s2200_s8 }
 0x5a6   :  { %1042 = vrot.lane.b32.xlu0 %v2379_v58, %s2200_s8 }
 0x60d   :  { %v722_v57 = vpop.xlane.xlu0 %721 }
 0x60e   :  { %v726_v59 = vadd.f32 %v2134_v55, %v722_v57 }
 0x610   :  { %2137 = vrcp.f32 %v726_v59 }
 0x611   :  { %v725_v0 = vpop.xlane.xlu1 %724  ;;  %v743_v1 = vpop.permute.xlu0 %742 }
 0x612   :  { %v727_v2 = vadd.f32 %v2136_v60, %v725_v0  ;;  %v752_v7 = vsel %vm494_vm3, %v743_v1, 0 }
 0x613   :  { %1990 = vmatpush3.bf16.msra.mxu1 %v752_v7 }
 0x614   :  { %2139 = vrcp.f32 %v727_v2  ;;  %2001 = vmatprep.subr.bf16.mxu1 %v2197_v16 }
 0x615   :  { %v795_v9 = vpop.permute.xlu1 %794  ;;  %v945_v12 = vpop.permute.xlu0 %944 }
 0x616   :  { %v804_v13 = vsel %vm494_vm3, %v795_v9, 0 }
 0x617   :  { %1996 = vmatpush3.bf16.msra.mxu0 %v804_v13 }
 0x618   :  { %2007 = vmatprep.subr.bf16.mxu0 %v2197_v16 }
 0x619   :  { %v2498_v14 = vpop.permute.xlu0 %942 }
 0x61d   :  { %v2138_v15 = vpop.eup %2137  ;;  %v1043_v17 = vpop.permute.xlu0 %1042 }
 0x61e   :  { %v1048_v18 = vsel %vm334_vm2, %v1043_v17, 0.0  ;;  %v2501_v21 = vmul.f32 %v2138_v15, %v2134_v55  ;;  %v2503_v22 = vmul.f32 %v2138_v15, %v2130_v48 }
 0x61f   :  { %1049 = vadd.xlane.f32.xlu0 %v1048_v18 }
 0x620   :  { %v740_v24 = vmul.f32 %v2468_v10, %v2501_v21  ;;  %v738_v25 = vpack.c.bf16 %v2503_v22, %v2503_v22 }
 0x621   :  { %v2140_v26 = vpop.eup %2139 }
 0x622   :  { %745 = vrot.lane.b32.xlu1 %v740_v24, %s2199_s6  ;;  %1992 = vmatmul.mubr.msk.bf16.vlgmr.msra.gmra.mxu1 %vm334_vm2, %v738_v25  ;;  %v2514_v28 = vmul.f32 %v2140_v26, %v2132_v50  ;;  %v2516_v29 = vmul.f32 %v2140_v26, %v2136_v60  ;;  %v950_v50 = vsel %vm334_vm2, %v945_v12, 0 }
 0x623   :  { %2003 = vmatprep.mubr.msk.bf16.mxu1 %vm2198_vm1, %v2197_v16  ;;  %2002 = vmatpush3.bf16.msra.mxu1 %v852_v34 }
 0x624   :  { %v739_v30 = vpack.c.bf16 %v2514_v28, %v2514_v28  ;;  %v741_v31 = vmul.f32 %v2468_v10, %v2516_v29  ;;  %2013 = vmatprep.subr.bf16.mxu1 %v2197_v16 }
 0x626   :  { %1998 = vmatmul.mubr.msk.bf16.vlgmr.msra.gmra.mxu0 %vm334_vm2, %v739_v30  ;;  %797 = vrot.lane.b32.xlu1 %v741_v31, %s2199_s6 }
 0x627   :  { %2008 = vmatpush3.bf16.msra.mxu0 %v899_v32  ;;  %2009 = vmatprep.mubr.msk.bf16.mxu0 %vm2198_vm1, %v2197_v16 }
 0x628   :  { %2019 = vmatprep.subr.bf16.mxu0 %v2197_v16 }
 0x62a   :  { %994 = vrot.lane.b32.xlu1 %v2393_v6, %s2200_s8 }
 0x62e   :  { %2010 = vmatmul.mubr.msk.bf16.vlgmr.msra.gmra.mxu0 %vm334_vm2, %v584_v23  ;;  %992 = vrot.lane.b32.xlu1 %v2377_v56, %s2200_s8 }
 0x62f   :  { %2021 = vmatprep.mubr.msk.bf16.mxu0 %vm2198_vm1, %v2197_v16 }
 0x632   :  { %1044 = vrot.lane.b32.xlu1 %v2391_v4, %s2200_s8 }
 0x694   :  { %v746_v19 = vpop.permute.xlu1 %745 }
 0x698   :  { %v798_v20 = vpop.permute.xlu1 %797 }
 0x69c   :  { %v995_v23 = vpop.permute.xlu1 %994 }
 0x69d   :  { %v1000_v35 = vsel %vm334_vm2, %v995_v23, 0 }
 0x69e   :  { %2020 = vmatpush3.bf16.xpose.msra.mxu0 %v1000_v35 }
 0x69f   :  { %2031 = vmatprep.subr.bf16.mxu0 %v2197_v16 }
 0x6a0   :  { %v993_v36 = vpop.permute.xlu1 %992 }
 0x6a4   :  { %v1045_v37 = vpop.permute.xlu1 %1044 }
 0x6a5   :  { %2022 = vmatmul.mubr.msk.bf16.vlgmr.msra.gmra.mxu0 %vm334_vm2, %v993_v36  ;;  %v1051_v38 = vsel %vm334_vm2, %v1045_v37, 0.0 }
 0x6a6   :  { %1052 = vadd.xlane.f32.xlu1 %v1051_v38  ;;  %2033 = vmatprep.mubr.msk.bf16.mxu0 %vm2198_vm1, %v2197_v16 }
 0x6a8   :  { %v1050_v24 = vpop.xlane.xlu0 %1049 }
 0x6e2   :  { %v788_v39 = vpop.f32.mrf.mxu1 }
 0x6e3   :  { %v789_v43 = vadd.f32 %v788_v39, %v746_v19 }
 0x6e4   :  { %v1993_v40 = vpop.f32.mrf.mxu1 }
 0x6e6   :  { %v791_v41 = vpop.f32.mrf.mxu1  ;;  %v840_v42 = vpop.f32.mrf.mxu0 }
 0x6e7   :  { %v841_v44 = vadd.f32 %v840_v42, %v798_v20 }
 0x6e8   :  { %v1994_v45 = vpop.f32.mrf.mxu1  ;;  %v1999_v46 = vpop.f32.mrf.mxu0 }
 0x6e9   :  { %v846_v48 = vpack.c.bf16 %v841_v44, %v789_v43 }
 0x6ea   :  { %v843_v49 = vpop.f32.mrf.mxu0 }
 0x6eb   :  { %2004 = vmatmul.mubr.msk.bf16.vlgmr.msra.gmra.mxu1 %vm334_vm2, %v846_v48 }
 0x6ec   :  { %2014 = vmatpush3.bf16.xpose.msra.mxu1 %v950_v50  ;;  %v2000_v51 = vpop.f32.mrf.mxu0  ;;  %2015 = vmatprep.mubr.msk.bf16.mxu1 %vm2198_vm1, %v2197_v16 }
 0x6ed   :  { %2025 = vmatprep.subr.bf16.mxu1 %v2197_v16 }
 0x6ee   :  { %v2558_v52 = vpop.f32.mrf.mxu0 }
 0x6f0   :  { %v2011_v53 = vpop.f32.mrf.mxu0 }
 0x6f1   :  { %v736_v53 = vadd.f32 %v2501_v21, %v2439_v63  ;;  %v737_v63 = vadd.f32 %v2516_v29, %v2447_v5  ;;  %v1201_v5 = vld [vmem:[%s2766_s9 + $0x8] sm:$0xf] }
 0x6f2   :  { %v2560_v54 = vpop.f32.mrf.mxu0 }
 0x6f3   :  { %2016 = vmatmul.mubr.msk.bf16.vlgmr.msra.gmra.mxu1 %vm334_vm2, %v2498_v14 }
 0x6f4   :  { %v2012_v55 = vpop.f32.mrf.mxu0  ;;  %2027 = vmatprep.mubr.msk.bf16.mxu1 %vm2198_vm1, %v2197_v16 }
 0x72f   :  { %v1053_v31 = vpop.xlane.xlu1 %1052 }
 0x765   :  { %v1036_v57 = vpop.f32.mrf.mxu0 }
 0x766   :  { %v1057_v17 = vsel %vm334_vm2, %v1036_v57, -inf }
 0x767   :  { %v2023_v59 = vpop.f32.mrf.mxu0 }
 0x769   :  { %v1039_v60 = vpop.f32.mrf.mxu0 }
 0x76b   :  { %v2024_v0 = vpop.f32.mrf.mxu0 }
 0x7ab   :  { %v2566_v1 = vpop.f32.mrf.mxu1 }
 0x7ad   :  { %v2005_v2 = vpop.f32.mrf.mxu1 }
 0x7af   :  { %v2568_v7 = vpop.f32.mrf.mxu1 }
 0x7b1   :  { %v2006_v9 = vpop.f32.mrf.mxu1 }
 0x7b3   :  { %v986_v12 = vpop.f32.mrf.mxu1 }
 0x7b4   :  { %v1054_v13 = vsel %vm334_vm2, %v986_v12, -inf }
 0x7b5   :  { %1055 = vmax.xlane.f32.xlu0 %v1054_v13  ;;  %v2017_v15 = vpop.f32.mrf.mxu1 }
 0x7b6   :  { %v735_v15 = vadd.f32 %v2514_v28, %v2445_v3  ;;  %v1206_v28 = vsel %vm494_vm3, %v1201_v5, 0 }
 0x7b7   :  { %v989_v14 = vpop.f32.mrf.mxu1 }
 0x7b9   :  { %1058 = vmax.xlane.f32.xlu0 %v1057_v17  ;;  %v2018_v18 = vpop.f32.mrf.mxu1 }
 0x83e   :  { %v1056_v25 = vpop.xlane.xlu0 %1055 }
 0x83f   :  { %v1060_v26 = vmax.f32 %v1056_v25, %v1050_v24 }
 0x841   :  { %v1062_v27 = vsub.f32 %v986_v12, %v1060_v26  ;;  %v1068_v30 = vsub.f32 %v1050_v24, %v1060_v26 }
 0x842   :  { %v1059_v32 = vpop.xlane.xlu0 %1058 }
 0x843   :  { %v1064_v33 = vmul.f32 1.442695, %v1062_v27  ;;  %v1061_v34 = vmax.f32 %v1059_v32, %v1053_v31  ;;  %v1070_v38 = vmul.f32 1.442695, %v1068_v30 }
 0x845   :  { %2141 = vpow2.f32 %v1064_v33  ;;  %v1063_v19 = vsub.f32 %v1036_v57, %v1061_v34  ;;  %v1069_v39 = vsub.f32 %v1053_v31, %v1061_v34  ;;  %v734_v57 = vadd.f32 %v2503_v22, %v2437_v62 }
 0x847   :  { %v1066_v20 = vmul.f32 1.442695, %v1063_v19  ;;  %v1072_v40 = vmul.f32 1.442695, %v1069_v39 }
 0x849   :  { %2143 = vpow2.f32 %v1066_v20 }
 0x84a   :  { %2145 = vpow2.f32 %v1070_v38 }
 0x84b   :  { %2147 = vpow2.f32 %v1072_v40 }
 0x852   :  { %v2142_v23 = vpop.eup %2141 }
 0x853   :  { %v1074_v35 = vsel %vm334_vm2, %v2142_v23, 0.0 }
 0x854   :  { %1075 = vadd.xlane.f32.xlu0 %v1074_v35 }
 0x856   :  { %v2144_v36 = vpop.eup %2143 }
 0x857   :  { %v1077_v37 = vsel %vm334_vm2, %v2144_v36, 0.0  ;;  %v2146_v41 = vpop.eup %2145 }
 0x858   :  { %1078 = vadd.xlane.f32.xlu1 %v1077_v37  ;;  %v2148_v44 = vpop.eup %2147 }
 0x869   :  { %1148 = vrot.lane.b32.xlu1 %v2403_v11, %s2200_s8 }
 0x86a   :  { %1096 = vrot.lane.b32.xlu0 %v2398_v8, %s2200_s8 }
 0x86e   :  { %1253 = vrot.lane.b32.xlu0 %v2384_v61, %s2201_s11 }
 0x872   :  { %1251 = vrot.lane.b32.xlu0 %v2368_v47, %s2201_s11 }
 0x876   :  { %1351 = vrot.lane.b32.xlu0 %v2379_v58, %s2201_s11 }
 0x8dd   :  { %v1076_v42 = vpop.xlane.xlu0 %1075 }
 0x8de   :  { %v1080_v43 = vadd.f32 %v2146_v41, %v1076_v42 }
 0x8e0   :  { %2149 = vrcp.f32 %v1080_v43 }
 0x8e1   :  { %v1079_v45 = vpop.xlane.xlu1 %1078  ;;  %v1097_v46 = vpop.permute.xlu0 %1096 }
 0x8e2   :  { %v1081_v48 = vadd.f32 %v2148_v44, %v1079_v45  ;;  %v1106_v61 = vsel %vm494_vm3, %v1097_v46, 0 }
 0x8e3   :  { %2026 = vmatpush3.bf16.msra.mxu1 %v1106_v61 }
 0x8e4   :  { %2151 = vrcp.f32 %v1081_v48  ;;  %2037 = vmatprep.subr.bf16.mxu1 %v2197_v16 }
 0x8e5   :  { %v1149_v47 = vpop.permute.xlu1 %1148  ;;  %v1254_v58 = vpop.permute.xlu0 %1253 }
 0x8e6   :  { %v1158_v49 = vsel %vm494_vm3, %v1149_v47, 0  ;;  %v1259_v24 = vsel %vm334_vm2, %v1254_v58, 0  ;;  %v936_v47 = vadd.f32 %v2558_v52, %v2566_v1 }
 0x8e7   :  { %2032 = vmatpush3.bf16.msra.mxu0 %v1158_v49 }
 0x8e8   :  { %2043 = vmatprep.subr.bf16.mxu0 %v2197_v16 }
 0x8e9   :  { %v1252_v50 = vpop.permute.xlu0 %1251 }
 0x8ed   :  { %v2150_v51 = vpop.eup %2149  ;;  %v1352_v55 = vpop.permute.xlu0 %1351 }
 0x8ee   :  { %v1357_v59 = vsel %vm334_vm2, %v1352_v55, 0.0  ;;  %v1084_v60 = vmul.f32 %v2150_v51, %v2142_v23  ;;  %v1086_v0 = vmul.f32 %v2150_v51, %v2146_v41  ;;  %v939_v51 = vadd.f32 %v2560_v54, %v2568_v7 }
 0x8ef   :  { %1358 = vadd.xlane.f32.xlu0 %v1357_v59 }
 0x8f0   :  { %v1092_v2 = vpack.c.bf16 %v1084_v60, %v1084_v60  ;;  %v2593_v9 = vadd.f32 %v1086_v0, %v736_v53  ;;  %v2595_v12 = vadd.f32 %v1084_v60, %v734_v57  ;;  %v1094_v3 = vmul.f32 %v2468_v10, %v1086_v0 }
 0x8f1   :  { %v2152_v13 = vpop.eup %2151 }
 0x8f2   :  { %2028 = vmatmul.mubr.msk.bf16.vlgmr.msra.gmra.mxu1 %vm334_vm2, %v1092_v2  ;;  %v1087_v62 = vmul.f32 %v2152_v13, %v2148_v44  ;;  %v1085_v21 = vmul.f32 %v2152_v13, %v2144_v36 }
 0x8f3   :  { %2039 = vmatprep.mubr.msk.bf16.mxu1 %vm2198_vm1, %v2197_v16  ;;  %2038 = vmatpush3.bf16.msra.mxu1 %v1206_v28 }
 0x8f4   :  { %v1095_v22 = vmul.f32 %v2468_v10, %v1087_v62  ;;  %v2605_v14 = vadd.f32 %v1087_v62, %v737_v63  ;;  %v1093_v17 = vpack.c.bf16 %v1085_v21, %v1085_v21  ;;  %v2607_v18 = vadd.f32 %v1085_v21, %v735_v15  ;;  %2049 = vmatprep.subr.bf16.mxu1 %v2197_v16 }
 0x8f6   :  { %1151 = vrot.lane.b32.xlu1 %v1095_v22, %s2200_s8  ;;  %2034 = vmatmul.mubr.msk.bf16.vlgmr.msra.gmra.mxu0 %vm334_vm2, %v1093_v17 }
 0x8f7   :  { %2044 = vmatpush3.bf16.xpose.msra.mxu0 %v1259_v24  ;;  %2045 = vmatprep.mubr.msk.bf16.mxu0 %vm2198_vm1, %v2197_v16 }
 0x8f8   :  { %2055 = vmatprep.subr.bf16.mxu0 %v2197_v16 }
 0x8fa   :  { %1099 = vrot.lane.b32.xlu1 %v1094_v3, %s2200_s8 }
 0x8fe   :  { %1303 = vrot.lane.b32.xlu1 %v2393_v6, %s2201_s11  ;;  %2046 = vmatmul.mubr.msk.bf16.vlgmr.msra.gmra.mxu0 %vm334_vm2, %v1252_v50 }
 0x8ff   :  { %2057 = vmatprep.mubr.msk.bf16.mxu0 %vm2198_vm1, %v2197_v16 }
 0x902   :  { %1301 = vrot.lane.b32.xlu1 %v2377_v56, %s2201_s11 }
 0x906   :  { %1353 = vrot.lane.b32.xlu1 %v2391_v4, %s2201_s11 }
 0x968   :  { %v1152_v6 = vpop.permute.xlu1 %1151 }
 0x96c   :  { %v1100_v29 = vpop.permute.xlu1 %1099 }
 0x970   :  { %v1304_v25 = vpop.permute.xlu1 %1303 }
 0x971   :  { %v1309_v36 = vsel %vm334_vm2, %v1304_v25, 0 }
 0x974   :  { %v1302_v26 = vpop.permute.xlu1 %1301 }
 0x978   :  { %v1354_v27 = vpop.permute.xlu1 %1353  ;;  %v1359_v43 = vpop.xlane.xlu0 %1358 }
 0x979   :  { %v1360_v30 = vsel %vm334_vm2, %v1354_v27, 0.0 }
 0x97a   :  { %1361 = vadd.xlane.f32.xlu1 %v1360_v30 }
 0x9b2   :  { %v1142_v56 = vpop.f32.mrf.mxu1 }
 0x9b3   :  { %v1143_v33 = vadd.f32 %v1142_v56, %v1100_v29 }
 0x9b4   :  { %v2029_v31 = vpop.f32.mrf.mxu1 }
 0x9b6   :  { %v1145_v4 = vpop.f32.mrf.mxu1  ;;  %v1194_v32 = vpop.f32.mrf.mxu0 }
 0x9b7   :  { %v1195_v34 = vadd.f32 %v1194_v32, %v1152_v6 }
 0x9b8   :  { %v2030_v19 = vpop.f32.mrf.mxu1  ;;  %v2035_v20 = vpop.f32.mrf.mxu0 }
 0x9b9   :  { %v1200_v23 = vpack.c.bf16 %v1195_v34, %v1143_v33 }
 0x9ba   :  { %v1197_v35 = vpop.f32.mrf.mxu0 }
 0x9bb   :  { %2040 = vmatmul.mubr.msk.bf16.vlgmr.msra.gmra.mxu1 %vm334_vm2, %v1200_v23  ;;  %v1510_v23 = vld [vmem:[%s2766_s9 + $0xc] sm:$0xf] }
 0x9bc   :  { %2050 = vmatpush3.bf16.xpose.msra.mxu1 %v1309_v36  ;;  %v2036_v37 = vpop.f32.mrf.mxu0  ;;  %2051 = vmatprep.mubr.msk.bf16.mxu1 %vm2198_vm1, %v2197_v16 }
 0x9bd   :  { %2061 = vmatprep.subr.bf16.mxu1 %v2197_v16 }
 0x9be   :  { %v1295_v38 = vpop.f32.mrf.mxu0 }
 0x9bf   :  { %v1363_v39 = vsel %vm334_vm2, %v1295_v38, -inf }
 0x9c0   :  { %v2047_v40 = vpop.f32.mrf.mxu0  ;;  %1364 = vmax.xlane.f32.xlu0 %v1363_v39 }
 0x9c2   :  { %v1298_v41 = vpop.f32.mrf.mxu0 }
 0x9c3   :  { %2052 = vmatmul.mubr.msk.bf16.vlgmr.msra.gmra.mxu1 %vm334_vm2, %v1302_v26 }
 0x9c4   :  { %v2048_v42 = vpop.f32.mrf.mxu0  ;;  %2063 = vmatprep.mubr.msk.bf16.mxu1 %vm2198_vm1, %v2197_v16 }
 0xa03   :  { %v1362_v54 = vpop.xlane.xlu1 %1361 }
 0xa49   :  { %v1365_v44 = vpop.xlane.xlu0 %1364 }
 0xa4a   :  { %v1369_v45 = vmax.f32 %v1365_v44, %v1359_v43 }
 0xa4c   :  { %v1377_v46 = vsub.f32 %v1359_v43, %v1369_v45  ;;  %v1371_v48 = vsub.f32 %v1295_v38, %v1369_v45 }
 0xa4e   :  { %v1373_v61 = vmul.f32 1.442695, %v1371_v48  ;;  %v1379_v15 = vmul.f32 1.442695, %v1377_v46 }
 0xa50   :  { %2153 = vpow2.f32 %v1373_v61 }
 0xa51   :  { %2155 = vpow2.f32 %v1379_v15 }
 0xa5d   :  { %v2154_v0 = vpop.eup %2153 }
 0xa5e   :  { %v1383_v52 = vsel %vm334_vm2, %v2154_v0, 0.0  ;;  %v2156_v21 = vpop.eup %2155 }
 0xa7b   :  { %v1242_v58 = vpop.f32.mrf.mxu1 }
 0xa7c   :  { %v2643_v49 = vadd.f32 %v1242_v58, %v936_v47 }
 0xa7d   :  { %v2041_v50 = vpop.f32.mrf.mxu1 }
 0xa7f   :  { %v1245_v53 = vpop.f32.mrf.mxu1 }
 0xa80   :  { %v2647_v55 = vadd.f32 %v1245_v53, %v939_v51 }
 0xa81   :  { %v2042_v57 = vpop.f32.mrf.mxu1 }
 0xa83   :  { %v1345_v59 = vpop.f32.mrf.mxu1 }
 0xa84   :  { %v1366_v60 = vsel %vm334_vm2, %v1345_v59, -inf }
 0xa85   :  { %1367 = vmax.xlane.f32.xlu0 %v1366_v60  ;;  %v2053_v2 = vpop.f32.mrf.mxu1 }
 0xa87   :  { %v1348_v13 = vpop.f32.mrf.mxu1 }
 0xa89   :  { %1384 = vadd.xlane.f32.xlu0 %v1383_v52  ;;  %v2054_v1 = vpop.f32.mrf.mxu1  ;;  %v2173_v52 = vld [vmem:[%s2786_s23] sm:$0xff] }
 0xa9f   :  { %1405 = vrot.lane.b32.xlu0 %v2398_v8, %s2201_s11 }
 0xb0e   :  { %v1368_v7 = vpop.xlane.xlu0 %1367 }
 0xb0f   :  { %v1370_v63 = vmax.f32 %v1368_v7, %v1362_v54 }
 0xb11   :  { %v1372_v62 = vsub.f32 %v1345_v59, %v1370_v63  ;;  %v1853_v59 = vld [vmem:[%s2767_s10] ss:$0 sm:$0xff] }
 0xb12   :  { %v1385_v22 = vpop.xlane.xlu0 %1384 }
 0xb13   :  { %v1375_v17 = vmul.f32 1.442695, %v1372_v62  ;;  %v1389_v24 = vadd.f32 %v2156_v21, %v1385_v22 }
 0xb15   :  { %2157 = vpow2.f32 %v1375_v17 }
 0xb16   :  { %v1406_v3 = vpop.permute.xlu0 %1405  ;;  %2159 = vrcp.f32 %v1389_v24 }
 0xb17   :  { %v1415_v5 = vsel %vm494_vm3, %v1406_v3, 0 }
 0xb18   :  { %2056 = vmatpush3.bf16.msra.mxu0 %v1415_v5 }
 0xb19   :  { %2067 = vmatprep.subr.bf16.mxu0 %v2197_v16 }
 0xb22   :  { %v2158_v28 = vpop.eup %2157 }
 0xb23   :  { %v1386_v8 = vsel %vm334_vm2, %v2158_v28, 0.0  ;;  %v2160_v6 = vpop.eup %2159 }
 0xb24   :  { %1387 = vadd.xlane.f32.xlu1 %v1386_v8  ;;  %v1393_v29 = vmul.f32 %v2160_v6, %v2154_v0  ;;  %v1395_v25 = vmul.f32 %v2160_v6, %v2156_v21 }
 0xb26   :  { %v1401_v26 = vpack.c.bf16 %v1393_v29, %v1393_v29  ;;  %v1399_v27 = vadd.f32 %v1395_v25, %v2593_v9  ;;  %v1397_v30 = vadd.f32 %v1393_v29, %v2595_v12  ;;  %v1403_v4 = vmul.f32 %v2468_v10, %v1395_v25  ;;  %v2107_v25 = vld [vmem:[%s2772_s15 + $0x8] sm:$0xff]  }
 0xb27   :  { %v1378_v9 = vsub.f32 %v1362_v54, %v1370_v63 }
 0xb28   :  { %2058 = vmatmul.mubr.msk.bf16.vlgmr.msra.gmra.mxu0 %vm334_vm2, %v1401_v26  ;;  %v1786_v56 = vmul.f32 0.25, %v1399_v27  ;;  %v1782_v31 = vmul.f32 0.25, %v1397_v30  ;;  %v2108_v26 = vld [vmem:[%s2772_s15] sm:$0xff]  }
 0xb29   :  { %2069 = vmatprep.mubr.msk.bf16.mxu0 %vm2198_vm1, %v2197_v16  ;;  %v1381_v12 = vmul.f32 1.442695, %v1378_v9 }
 0xb2a   :  { %1784 = vst.msk [vmem:[#allocation2] sm:$0xff] %vm334_vm2, %v1782_v31 }
 0xb2b   :  { %1789 = vst.msk [vmem:[#allocation2] sm:$0xff] %vm1788_vm4, %v1786_v56  ;;  %2161 = vpow2.f32 %v1381_v12 }
 0xb35   :  { %1457 = vrot.lane.b32.xlu1 %v2403_v11, %s2201_s11  ;;  %v1515_v11 = vsel %vm494_vm3, %v1510_v23, 0  ;;  %v1855_v23 = vld [vmem:[%s2771_s14] ss:$0 sm:$0xff] }
 0xb36   :  { %2068 = vmatpush3.bf16.msra.mxu0 %v1515_v11 }
 0xb37   :  { %2081 = vmatprep.subr.bf16.mxu0 %v2197_v16 }
 0xb38   :  { %v2162_v32 = vpop.eup %2161 }
 0xb39   :  { %1408 = vrot.lane.b32.xlu1 %v1403_v4, %s2201_s11 }
 0xbad   :  { %v1388_v33 = vpop.xlane.xlu1 %1387 }
 0xbae   :  { %v1390_v34 = vadd.f32 %v2162_v32, %v1388_v33  ;;  %v1854_v33 = vld [vmem:[%s2770_s13] ss:$0 sm:$0xff] }
 0xbb0   :  { %2163 = vrcp.f32 %v1390_v34 }
 0xbb1   :  { %v1458_v19 = vpop.permute.xlu1 %1457 }
 0xbb2   :  { %v1467_v20 = vsel %vm494_vm3, %v1458_v19, 0 }
 0xbb3   :  { %2062 = vmatpush3.bf16.msra.mxu1 %v1467_v20 }
 0xbb4   :  { %2073 = vmatprep.subr.bf16.mxu1 %v2197_v16 }
 0xbbd   :  { %v2164_v35 = vpop.eup %2163 }
 0xbbe   :  { %v1394_v36 = vmul.f32 %v2164_v35, %v2158_v28  ;;  %v1396_v37 = vmul.f32 %v2164_v35, %v2162_v32 }
 0xbc0   :  { %v1402_v38 = vpack.c.bf16 %v1394_v36, %v1394_v36  ;;  %v1400_v39 = vadd.f32 %v1396_v37, %v2605_v14  ;;  %v1404_v40 = vmul.f32 %v2468_v10, %v1396_v37  ;;  %v1398_v41 = vadd.f32 %v1394_v36, %v2607_v18  ;;  %v1409_v10 = vpop.permute.xlu1 %1408 }
 0xbc2   :  { %2064 = vmatmul.mubr.msk.bf16.vlgmr.msra.gmra.mxu1 %vm334_vm2, %v1402_v38  ;;  %v1787_v42 = vmul.f32 0.25, %v1400_v39  ;;  %1460 = vrot.lane.b32.xlu1 %v1404_v40, %s2201_s11  ;;  %v1783_v43 = vmul.f32 0.25, %v1398_v41  ;;  %v2109_v38 = vld [vmem:[%s2774_s17 + $0x18] sm:$0xff]   ;;  %v2110_v39 = vld [vmem:[%s2774_s17 + $0x10] sm:$0xff]   ;;  %v2111_v40 = vld [vmem:[%s2774_s17 + $0x8] sm:$0xff]  }
 0xbc3   :  { %2077 = vmatprep.mubr.msk.bf16.mxu1 %vm2198_vm1, %v2197_v16  ;;  %2074 = vmatpush3.bf16.msra.mxu1 %v2107_v25  ;;  %v2112_v41 = vld [vmem:[%s2774_s17] sm:$0xff]  }
 0xbc4   :  { %1785 = vst.msk [vmem:[#allocation2 + $0x8] sm:$0xff] %vm334_vm2, %v1783_v43  ;;  %2075 = vmatprep.subr.bf16.mxu1 %v2197_v16 }
 0xbc5   :  { %1790 = vst.msk [vmem:[#allocation2 + $0x8] sm:$0xff] %vm1788_vm4, %v1787_v42  ;;  %v1856_v42 = vld [vmem:[%s2773_s16] ss:$0 sm:$0xff]  ;;  %s2202_s16 = smov [#allocation2]  }
 0xbc6   :  { %s1798_s17 = sshll.u32 %s2202_s16, 4  ;;  %s1799_s17 = int_to_ptr.vmem [resolvable:$true] %s1798_s17 }
 0xbc7   :  { %2076 = vmatpush3.bf16.msra.mxu1 %v2108_v26  ;;  %s2175_s26 = scalar_lea.vmem %s1799_s17, 256  ;;  %p2180_p1 = scmp.lt.s32.totalorder %s1799_s17, %s1799_s17 }
 0xbc8   :  { %p2176_p0 = scmp.ne.s32.totalorder %s1799_s17, %s2175_s26  ;;  %p2181_p2 = scmp.lt.s32.totalorder %s2175_s26, %s2175_s26 }
 0xbca   :  { %p2182_p3 = por %p2181_p2, %p2180_p1 }
 0xbcc   :  { %p2183_p4 = pnand %p2182_p3, %p2176_p0 }
 0xbe8   :  { %v1451_v44 = vpop.f32.mrf.mxu0 }
 0xbe9   :  { %v1452_v61 = vadd.f32 %v1451_v44, %v1409_v10 }
 0xbea   :  { %v2059_v45 = vpop.f32.mrf.mxu0 }
 0xbec   :  { %v1454_v14 = vpop.f32.mrf.mxu0 }
 0xbee   :  { %v2060_v46 = vpop.f32.mrf.mxu0 }
 0xc34   :  { %v1461_v48 = vpop.permute.xlu1 %1460 }
 0xc82   :  { %v1503_v18 = vpop.f32.mrf.mxu1 }
 0xc83   :  { %v1504_v47 = vadd.f32 %v1503_v18, %v1461_v48 }
 0xc84   :  { %v2065_v58 = vpop.f32.mrf.mxu1 }
 0xc85   :  { %v1509_v50 = vpack.c.bf16 %v1504_v47, %v1452_v61 }
 0xc86   :  { %v1506_v51 = vpop.f32.mrf.mxu1 }
 0xc87   :  { %2070 = vmatmul.mubr.msk.bf16.vlgmr.msra.gmra.mxu0 %vm334_vm2, %v1509_v50 }
 0xc88   :  { %v2066_v53 = vpop.f32.mrf.mxu1  ;;  %2089 = vmatprep.mubr.msk.bf16.mxu0 %vm2198_vm1, %v2197_v16  ;;  %2082 = vmatpush3.bf16.msra.mxu0 %v2109_v38 }
 0xc89   :  { %2083 = vmatprep.subr.bf16.mxu0 %v2197_v16 }
 0xc8c   :  { %2084 = vmatpush3.bf16.msra.mxu0 %v2110_v39 }
 0xc8d   :  { %2085 = vmatprep.subr.bf16.mxu0 %v2197_v16 }
 0xc90   :  { %2086 = vmatpush3.bf16.msra.mxu0 %v2111_v40 }
 0xc91   :  { %2087 = vmatprep.subr.bf16.mxu0 %v2197_v16 }
 0xc94   :  { %2088 = vmatpush3.bf16.msra.mxu0 %v2112_v41 }
 0xd47   :  { %v1551_v57 = vpop.f32.mrf.mxu0 }
 0xd48   :  { %v1558_v60 = vadd.f32 %v1551_v57, %v2643_v49  ;;  %v2174_v49 = vld [vmem:[%s2786_s23 + $0x8] sm:$0xff] }
 0xd49   :  { %v2071_v0 = vpop.f32.mrf.mxu0 }
 0xd4a   :  { %v1567_v2 = vadd.f32 %v1853_v59, %v1558_v60 }
 0xd4b   :  { %v1554_v13 = vpop.f32.mrf.mxu0 }
 0xd4c   :  { %v2693_v1 = vadd.f32 %v2173_v52, %v1567_v2  ;;  %v1559_v15 = vadd.f32 %v1554_v13, %v2647_v55 }
 0xd4d   :  { %v2072_v54 = vpop.f32.mrf.mxu0 }
 0xd4e   :  { %v1568_v7 = vadd.f32 %v1853_v59, %v1559_v15  ;;  %v1573_v63 = vsel %vm70_vm0, %v2693_v1, 0.0 }
 0xd4f   :  { %1574 = vadd.xlane.f32.xlu0 %v1573_v63 }
 0xd50   :  { %v2701_v62 = vadd.f32 %v2174_v49, %v1568_v7 }
 0xd52   :  { %v1576_v21 = vsel %vm70_vm0, %v2701_v62, 0.0 }
 0xd53   :  { %1577 = vadd.xlane.f32.xlu1 %v1576_v21 }
 0xdd8   :  { %v1575_v22 = vpop.xlane.xlu0 %1574 }
 0xdd9   :  { %v1579_v17 = vmul.f32 0.03125, %v1575_v22 }
 0xddb   :  { %v1581_v55 = vsub.f32 %v2693_v1, %v1579_v17 }
 0xddc   :  { %v1578_v24 = vpop.xlane.xlu1 %1577 }
 0xddd   :  { %v1580_v3 = vmul.f32 0.03125, %v1578_v24  ;;  %v1583_v5 = vmul.f32 %v1581_v55, %v1581_v55 }
 0xddf   :  { %v1582_v28 = vsub.f32 %v2701_v62, %v1580_v3  ;;  %v1585_v8 = vsel %vm70_vm0, %v1583_v5, 0.0 }
 0xde0   :  { %1586 = vadd.xlane.f32.xlu0 %v1585_v8 }
 0xde1   :  { %v1584_v6 = vmul.f32 %v1582_v28, %v1582_v28 }
 0xde3   :  { %v1588_v29 = vsel %vm70_vm0, %v1584_v6, 0.0 }
 0xde4   :  { %1589 = vadd.xlane.f32.xlu0 %v1588_v29 }
 0xe69   :  { %v1587_v27 = vpop.xlane.xlu0 %1586 }
 0xe6a   :  { %v1591_v30 = vmul.f32 0.03125, %v1587_v27 }
 0xe6c   :  { %v1593_v56 = vadd.f32 1e-05, %v1591_v30 }
 0xe6d   :  { %v1590_v31 = vpop.xlane.xlu0 %1589 }
 0xe6e   :  { %2165 = vrsqrt.f32 %v1593_v56  ;;  %v1592_v4 = vmul.f32 0.03125, %v1590_v31 }
 0xe70   :  { %v1594_v9 = vadd.f32 1e-05, %v1592_v4 }
 0xe72   :  { %2167 = vrsqrt.f32 %v1594_v9 }
 0xe7b   :  { %v2166_v12 = vpop.eup %2165 }
 0xe7c   :  { %v1597_v32 = vmul.f32 %v2166_v12, %v1581_v55 }
 0xe7e   :  { %v1605_v20 = vmul.f32 %v1854_v33, %v1597_v32 }
 0xe7f   :  { %v2168_v34 = vpop.eup %2167 }
 0xe80   :  { %v1598_v19 = vmul.f32 %v2168_v34, %v1582_v28  ;;  %v1613_v35 = vadd.f32 %v1855_v23, %v1605_v20 }
 0xe82   :  { %v1606_v11 = vmul.f32 %v1854_v33, %v1598_v19 }
 0xe84   :  { %v1614_v36 = vadd.f32 %v1855_v23, %v1606_v11 }
 0xe86   :  { %v1615_v37 = vpack.c.bf16 %v1614_v36, %v1613_v35 }
 0xe88   :  { %2078 = vmatmul.mubr.msk.bf16.vlgmr.msra.gmra.mxu1 %vm70_vm0, %v1615_v37 }
 0xf48   :  { %v1676_v43 = vpop.f32.mrf.mxu1 }
 0xf49   :  { %v1677_v44 = vadd.f32 %v1856_v42, %v1676_v43 }
 0xf4a   :  { %v2079_v45 = vpop.f32.mrf.mxu1 }
 0xf4b   :  { %v1685_v14 = vmul.f32 0.70710677, %v1677_v44  ;;  %v1683_v58 = vmul.f32 0.5, %v1677_v44 }
 0xf4c   :  { %v1679_v46 = vpop.f32.mrf.mxu1 }
 0xf4d   :  { %2169 = verf.f32 %v1685_v14  ;;  %v1680_v10 = vadd.f32 %v1856_v42, %v1679_v46 }
 0xf4e   :  { %v2080_v48 = vpop.f32.mrf.mxu1 }
 0xf4f   :  { %v1686_v18 = vmul.f32 0.70710677, %v1680_v10  ;;  %v1684_v50 = vmul.f32 0.5, %v1680_v10 }
 0xf51   :  { %2171 = verf.f32 %v1686_v18 }
 0xf5a   :  { %v2170_v16 = vpop.eup %2169 }
 0xf5b   :  { %v1689_v61 = vadd.f32 1.0, %v2170_v16 }
 0xf5d   :  { %v1691_v53 = vmul.f32 %v1689_v61, %v1683_v58 }
 0xf5e   :  { %v2172_v47 = vpop.eup %2171 }
 0xf5f   :  { %v1690_v51 = vadd.f32 1.0, %v2172_v47 }
 0xf61   :  { %v1692_v57 = vmul.f32 %v1690_v51, %v1684_v50 }
 0xf63   :  { %v1693_v59 = vpack.c.bf16 %v1692_v57, %v1691_v53 }
 0xf65   :  { %2090 = vmatmul.mubr.msk.bf16.vlgmr.msra.gmra.mxu0 %vm1733_vm5, %v1693_v59 }
 0xf66   :  { %2186 = shalt.err (!%p2183_p4)
}
 0xf67   :  { %s2203_s27 = smov 128   ;;  %s2204_s9 = smov 8   ;;  %v1860_v60 = vld [vmem:[%s2775_s18] ss:$0 sm:$0xff] }
 0xf68   :  { %1804 = dma.vmem_to_hbm [thread:$0]  %s1799_s17, 256, %s2777_s20, [#allocation3], %s2203_s27, %s2203_s27, %s2204_s9  }
0x1025   :  { %v1771_v0 = vpop.f32.mrf.mxu0 }
0x1026   :  { %v1772_v2 = vadd.f32 %v1860_v60, %v1771_v0 }
0x1027   :  { %v2091_v13 = vpop.f32.mrf.mxu0 }
0x1028   :  { %v1778_v52 = vadd.f32 %v1772_v2, %v2693_v1 }
0x1029   :  { %v1774_v15 = vpop.f32.mrf.mxu0 }
0x102a   :  { %1780 = vst.msk [vmem:[%s2776_s19] sm:$0xff] %vm70_vm0, %v1778_v52  ;;  %v1775_v54 = vadd.f32 %v1860_v60, %v1774_v15 }
0x102b   :  { %v2092_v7 = vpop.f32.mrf.mxu0 }
0x102c   :  { %v1779_v63 = vadd.f32 %v1775_v54, %v2701_v62 }
0x102e   :  { %1781 = vst.msk [vmem:[%s2776_s19 + $0x8] sm:$0xff] %vm70_vm0, %v1779_v63 }
0x102f   :  { %2195 = dma.done.wait [#allocation3], 256  }
0x1030   :  { %2196 = vsyncadd [#allocation3], 4294967040 }
0x1031   :  { %1810 = vsyncpa [#allocation3], 1 }

</bundles_post_ra>
